<compile_context>
chip_gen: v7x
topology: tpu7x:2x2x1
jax: 0.10.0
libtpu: 0.0.40
codegen_flags: <defaults>
</compile_context>

<pallas_src>
import functools
import math

import jax
import jax.numpy as jnp
from jax.experimental import pallas as pl
from jax.experimental.pallas import tpu as pltpu


def _layer_norm(x, w, b, eps):
    mu = jnp.mean(x, axis=-1, keepdims=True)
    xc = x - mu
    var = jnp.mean(xc * xc, axis=-1, keepdims=True)
    return xc * jax.lax.rsqrt(var + eps) * w + b


# Rows of the packed parameter slab (shape (_N_PROWS, max(E, F)), f32).
_R_BQ, _R_BK, _R_BV, _R_OB = 0, 1, 2, 3
_R_LN1W, _R_LN1B, _R_LN2W, _R_LN2B = 4, 5, 6, 7
_R_L2B, _R_L1B = 8, 9
_N_PROWS = 10


def encoder_layer_kernel(
    q_ref, k_ref, v_ref,        # (M, E) f32 activations, M = Bblk*S
    pv_ref,                     # (_N_PROWS, max(E,F)) f32 packed biases / LN params
    wq_ref, wk_ref, wv_ref,     # (E, E) bf16, pre-transposed (use as x @ w)
    ow_ref,                     # (E, E) bf16, pre-transposed
    l1w_ref,                    # (E, F) bf16, pre-transposed
    l2w_ref,                    # (F, E) bf16, pre-transposed
    o_ref,                      # (M, E) f32 output
    ctx_ref,                    # (M, E) f32 VMEM scratch: per-head attention contexts
    *, seq_len, nhead, eps):
    M, E = q_ref.shape
    F = l1w_ref.shape[1]
    S = seq_len
    Bblk = M // S
    Dh = E // nhead
    scale = 1.0 / math.sqrt(Dh)
    f32 = jnp.float32
    bf16 = jnp.bfloat16

    pp = pv_ref[...]
    bq = pp[_R_BQ:_R_BQ + 1, 0:E]
    bk = pp[_R_BK:_R_BK + 1, 0:E]
    bv = pp[_R_BV:_R_BV + 1, 0:E]
    ob = pp[_R_OB:_R_OB + 1, 0:E]
    ln1w = pp[_R_LN1W:_R_LN1W + 1, 0:E]
    ln1b = pp[_R_LN1B:_R_LN1B + 1, 0:E]
    ln2w = pp[_R_LN2W:_R_LN2W + 1, 0:E]
    ln2b = pp[_R_LN2B:_R_LN2B + 1, 0:E]
    l2b = pp[_R_L2B:_R_L2B + 1, 0:E]
    l1b = pp[_R_L1B:_R_L1B + 1, 0:F]

    q_in = q_ref[...]
    k_in = k_ref[...]
    v_in = v_ref[...]

    # norm1 on q/k/v inputs. NOTE: this module applies LN1 to q/k/v before
    # attention AND again after the residual -- that is exactly the post-norm
    # branch of the provided forward (not standard nn.TransformerEncoderLayer).
    qn = _layer_norm(q_in, ln1w, ln1b, eps).astype(bf16)
    kn = _layer_norm(k_in, ln1w, ln1b, eps).astype(bf16)
    vn = _layer_norm(v_in, ln1w, ln1b, eps).astype(bf16)

    # QKV projections: bf16 operands on the MXU, f32 accumulation + f32 bias.
    # 1/sqrt(Dh) folded into q once.
    q_p = (jnp.dot(qn, wq_ref[...], preferred_element_type=f32) + bq) * scale
    k_p = jnp.dot(kn, wk_ref[...], preferred_element_type=f32) + bk
    v_p = jnp.dot(vn, wv_ref[...], preferred_element_type=f32) + bv

    # Attention: block-diagonal over the Bblk batch rows, per head. Each head
    # writes its context into ctx_ref; a single K=E output projection follows
    # (replaces nhead K=Dh matmuls + nhead-1 full (M,E) accumulator adds).
    # TODO(synk): at production sizes (Dh a multiple of 128) replace the
    #             unrolled loop + lane sub-slices with a head-batched dot_general.
    for b in range(Bblk):
        r0 = b * S
        for h in range(nhead):
            c0 = h * Dh
            qh = q_p[r0:r0 + S, c0:c0 + Dh].astype(bf16)
            kh = k_p[r0:r0 + S, c0:c0 + Dh].astype(bf16)
            vh = v_p[r0:r0 + S, c0:c0 + Dh].astype(bf16)
            # q @ k^T via dot_general contracting last dims (no materialized .T)
            s = jax.lax.dot_general(qh, kh, (((1,), (1,)), ((), ())),
                                    preferred_element_type=f32)
            s = s - jnp.max(s, axis=-1, keepdims=True)
            p = jnp.exp(s)
            p = p / jnp.sum(p, axis=-1, keepdims=True)   # exact softmax denom
            ctx_ref[r0:r0 + S, c0:c0 + Dh] = jnp.dot(
                p.astype(bf16), vh, preferred_element_type=f32)

    attn = jnp.dot(ctx_ref[...].astype(bf16), ow_ref[...],
                   preferred_element_type=f32) + ob

    # Residual + norm1 (post-norm); dropout1 == identity at inference.
    x1 = _layer_norm(v_in + attn, ln1w, ln1b, eps)

    # Feed-forward: linear1 -> relu -> linear2.
    h1 = jnp.dot(x1.astype(bf16), l1w_ref[...], preferred_element_type=f32) + l1b
    h1 = jnp.maximum(h1, 0.0)
    ff = jnp.dot(h1.astype(bf16), l2w_ref[...], preferred_element_type=f32) + l2b

    # Residual + norm2; dropout2 == identity at inference.
    # TODO(synk): at production E (multiple of 128) this store becomes
    #             lane-dense; at the toy E=32 the layout is fixed by the module.
    o_ref[...] = _layer_norm(x1 + ff, ln2w, ln2b, eps)


def transformer_encoder_layer(query, key, value, entities, params, *,
                              nhead, eps=1e-5, block_batch=None):
    # `entities` is accepted but unused, exactly like the PyTorch forward.
    del entities
    B, S, E = query.shape
    F = params["lin1_w"].shape[0]
    bf16 = jnp.bfloat16
    f32 = jnp.float32

    if block_batch is None:
        # Keep >=2 grid steps when possible (feeds both v7x TensorCores) while
        # still blocking batch rows to amortize per-step overhead on v5e/v6e.
        block_batch = max(1, B // 2)
    assert B % block_batch == 0, "batch must be divisible by block_batch"
    nb = B // block_batch
    M = block_batch * S

    # Free row-major reshapes: kernel sees 2-D (M,E) slabs, no in-kernel reshape.
    q2 = query.reshape(B * S, E)
    k2 = key.reshape(B * S, E)
    v2 = value.reshape(B * S, E)

    # Host-side glue (parameter-sized, done once per call):
    #  * split the fused in_proj weight, transpose every matmul weight ONCE and
    #    pre-cast to bf16 (f32 accumulation happens inside the kernel)
    #  * pack all tiny biases / LN params into one f32 slab (one DMA, one block)
    w_in = params["in_proj_w"]
    wq_t = w_in[0:E].T.astype(bf16)
    wk_t = w_in[E:2 * E].T.astype(bf16)
    wv_t = w_in[2 * E:3 * E].T.astype(bf16)
    ow_t = params["out_proj_w"].T.astype(bf16)
    l1w_t = params["lin1_w"].T.astype(bf16)                   # (E, F)
    l2w_t = params["lin2_w"].T.astype(bf16)                   # (F, E)

    P = max(E, F)

    def row(vec):
        vec = vec.astype(f32)
        return jnp.pad(vec, (0, P - vec.shape[0])).reshape(1, P)

    pvec = jnp.concatenate([
        row(params["in_proj_b"][0:E]),
        row(params["in_proj_b"][E:2 * E]),
        row(params["in_proj_b"][2 * E:3 * E]),
        row(params["out_proj_b"]),
        row(params["ln1_w"]), row(params["ln1_b"]),
        row(params["ln2_w"]), row(params["ln2_b"]),
        row(params["lin2_b"]),
        row(params["lin1_b"]),
    ], axis=0)                                                 # (_N_PROWS, P)

    act_spec = pl.BlockSpec((M, E), lambda i: (i, 0))
    # Whole-array constant-index blocks: resident copies reused across steps.
    # TODO(synk): at production E/F sizes single-buffer these weights
    #             (pipeline_mode=pl.Buffered(1)) or move them to pl.ANY with a
    #             one-time manual copy, and tile linear1/linear2 over F on an
    #             "arbitrary" reduction grid axis.
    const_specs = [pl.BlockSpec(w.shape, lambda i: (0, 0))
                   for w in (pvec, wq_t, wk_t, wv_t, ow_t, l1w_t, l2w_t)]

    # Generation-aware VMEM budget (64 MiB physical on v7x vs 128 MiB v5e/v6e).
    try:
        vmem_cap = int(pltpu.get_tpu_info().vmem_capacity_bytes)
    except Exception:
        vmem_cap = 64 * 1024 * 1024
    vmem_limit = min(vmem_cap * 3 // 4, 112 * 1024 * 1024)

    flops = 2 * B * S * E * (4 * E + 2 * S + 2 * F)
    bytes_accessed = (4 * 4 * B * S * E                 # q,k,v in + out (f32)
                      + 2 * (4 * E * E + 2 * E * F)     # bf16 weights
                      + 4 * _N_PROWS * P)               # packed params
    cost = pl.CostEstimate(flops=flops,
                           transcendentals=B * nhead * S * S,
                           bytes_accessed=bytes_accessed)

    out = pl.pallas_call(
        functools.partial(encoder_layer_kernel, seq_len=S, nhead=nhead, eps=eps),
        out_shape=jax.ShapeDtypeStruct((B * S, E), f32),
        grid=(nb,),
        in_specs=[act_spec, act_spec, act_spec] + const_specs,
        out_specs=pl.BlockSpec((M, E), lambda i: (i, 0)),
        scratch_shapes=[pltpu.VMEM((M, E), f32)],
        compiler_params=pltpu.CompilerParams(
            dimension_semantics=("parallel",),
            vmem_limit_bytes=vmem_limit),
        cost_estimate=cost,
    )(q2, k2, v2, pvec, wq_t, wk_t, wv_t, ow_t, l1w_t, l2w_t)
    return out.reshape(B, S, E)


def reference(query, key, value, params, *, nhead, eps=1e-5):
    """Plain-JAX f32 reference for correctness checking."""
    def ln(x, w, b):
        mu = x.mean(-1, keepdims=True)
        var = ((x - mu) ** 2).mean(-1, keepdims=True)
        return (x - mu) / jnp.sqrt(var + eps) * w + b

    B, S, E = query.shape
    Dh = E // nhead
    qn = ln(query, params["ln1_w"], params["ln1_b"])
    kn = ln(key, params["ln1_w"], params["ln1_b"])
    vn = ln(value, params["ln1_w"], params["ln1_b"])
    wq, wk, wv = jnp.split(params["in_proj_w"], 3, axis=0)
    bq, bk, bv = jnp.split(params["in_proj_b"], 3)
    q = qn @ wq.T + bq
    k = kn @ wk.T + bk
    v = vn @ wv.T + bv
    qh = q.reshape(B, S, nhead, Dh).transpose(0, 2, 1, 3)
    kh = k.reshape(B, S, nhead, Dh).transpose(0, 2, 1, 3)
    vh = v.reshape(B, S, nhead, Dh).transpose(0, 2, 1, 3)
    s = jnp.einsum("bhqd,bhkd->bhqk", qh, kh) / jnp.sqrt(Dh)
    p = jax.nn.softmax(s, axis=-1)
    o = jnp.einsum("bhqk,bhkd->bhqd", p, vh).transpose(0, 2, 1, 3).reshape(B, S, E)
    attn = o @ params["out_proj_w"].T + params["out_proj_b"]
    x1 = ln(value + attn, params["ln1_w"], params["ln1_b"])
    h = jax.nn.relu(x1 @ params["lin1_w"].T + params["lin1_b"])
    ff = h @ params["lin2_w"].T + params["lin2_b"]
    return ln(x1 + ff, params["ln2_w"], params["ln2_b"])


def init_params(key, d_model, dim_feedforward):
    ks = jax.random.split(key, 12)
    s = 0.05
    return {
        "in_proj_w": s * jax.random.normal(ks[0], (3 * d_model, d_model), jnp.float32),
        "in_proj_b": s * jax.random.normal(ks[1], (3 * d_model,), jnp.float32),
        "out_proj_w": s * jax.random.normal(ks[2], (d_model, d_model), jnp.float32),
        "out_proj_b": s * jax.random.normal(ks[3], (d_model,), jnp.float32),
        "ln1_w": 1.0 + s * jax.random.normal(ks[4], (d_model,), jnp.float32),
        "ln1_b": s * jax.random.normal(ks[5], (d_model,), jnp.float32),
        "ln2_w": 1.0 + s * jax.random.normal(ks[6], (d_model,), jnp.float32),
        "ln2_b": s * jax.random.normal(ks[7], (d_model,), jnp.float32),
        "lin1_w": s * jax.random.normal(ks[8], (dim_feedforward, d_model), jnp.float32),
        "lin1_b": s * jax.random.normal(ks[9], (dim_feedforward,), jnp.float32),
        "lin2_w": s * jax.random.normal(ks[10], (d_model, dim_feedforward), jnp.float32),
        "lin2_b": s * jax.random.normal(ks[11], (d_model,), jnp.float32),
    }


if __name__ == "__main__":
    B, S, d_model, nhead, dim_ff = 2, 8, 32, 4, 64

    root = jax.random.PRNGKey(0)
    kq, kk, kv, ke, kp = jax.random.split(root, 5)
    query = jax.random.normal(kq, (B, S, d_model), jnp.float32)
    key = jax.random.normal(kk, (B, S, d_model), jnp.float32)
    value = jax.random.normal(kv, (B, S, d_model), jnp.float32)
    entities = jax.random.normal(ke, (B, S, d_model), jnp.float32)  # unused, as in torch
    params = init_params(kp, d_model, dim_ff)

    ref = jax.block_until_ready(reference(query, key, value, params,
                                          nhead=nhead, eps=1e-5))

    # Default: grid=(2,) parallel over batch (keeps both v7x TensorCores busy).
    out = transformer_encoder_layer(query, key, value, entities, params,
                                    nhead=nhead, eps=1e-5)
    out = jax.block_until_ready(out)
    assert out.shape == (B, S, d_model)
    assert jnp.allclose(out, ref, atol=2e-2, rtol=2e-2), \
        f"max abs err {jnp.max(jnp.abs(out - ref))}"

    # Batch-blocked variant (grid=(1,), all rows stacked -> matmul M = B*S):
    # the layout v5e/v6e prefer; also validates the row-stacking path.
    out_blk = transformer_encoder_layer(query, key, value, entities, params,
                                        nhead=nhead, eps=1e-5, block_batch=B)
    out_blk = jax.block_until_ready(out_blk)
    assert jnp.allclose(out_blk, ref, atol=2e-2, rtol=2e-2), \
        f"max abs err (blocked) {jnp.max(jnp.abs(out_blk - ref))}"

    print("KERNEL_OK")
</pallas_src>

<mosaic_0001>
module attributes {stable_mosaic.version = 11 : i64} {
  func.func @encoder_layer_kernel(%arg0: i32, %arg1: memref<8x32xf32, #tpu.memory_space<vmem>>, %arg2: memref<8x32xf32, #tpu.memory_space<vmem>>, %arg3: memref<8x32xf32, #tpu.memory_space<vmem>>, %arg4: memref<10x64xf32, #tpu.memory_space<vmem>>, %arg5: memref<32x32xbf16, #tpu.memory_space<vmem>>, %arg6: memref<32x32xbf16, #tpu.memory_space<vmem>>, %arg7: memref<32x32xbf16, #tpu.memory_space<vmem>>, %arg8: memref<32x32xbf16, #tpu.memory_space<vmem>>, %arg9: memref<32x64xbf16, #tpu.memory_space<vmem>>, %arg10: memref<64x32xbf16, #tpu.memory_space<vmem>>, %arg11: memref<8x32xf32, #tpu.memory_space<vmem>>, %arg12: memref<8x32xf32, #tpu.memory_space<vmem>>) attributes {dimension_semantics = [#tpu.dimension_semantics<parallel>], iteration_bounds = array<i64: 2>, scalar_prefetch = 0 : i64, scratch_operands = 1 : i64, tpu.core_type = #tpu.core_type<tc>, window_params = [{transform_indices = @transform_0, window_bounds = array<i64: 8, 32>}, {transform_indices = @transform_1, window_bounds = array<i64: 8, 32>}, {transform_indices = @transform_2, window_bounds = array<i64: 8, 32>}, {pipeline_mode = #tpu.pipeline_mode<synchronous>, transform_indices = @transform_3, window_bounds = array<i64: 10, 64>}, {pipeline_mode = #tpu.pipeline_mode<synchronous>, transform_indices = @transform_4, window_bounds = array<i64: 32, 32>}, {pipeline_mode = #tpu.pipeline_mode<synchronous>, transform_indices = @transform_5, window_bounds = array<i64: 32, 32>}, {pipeline_mode = #tpu.pipeline_mode<synchronous>, transform_indices = @transform_6, window_bounds = array<i64: 32, 32>}, {pipeline_mode = #tpu.pipeline_mode<synchronous>, transform_indices = @transform_7, window_bounds = array<i64: 32, 32>}, {pipeline_mode = #tpu.pipeline_mode<synchronous>, transform_indices = @transform_8, window_bounds = array<i64: 32, 64>}, {pipeline_mode = #tpu.pipeline_mode<synchronous>, transform_indices = @transform_9, window_bounds = array<i64: 64, 32>}, {transform_indices = @transform_10, window_bounds = array<i64: 8, 32>}]} {
    %c0 = arith.constant 0 : index
    %c0_0 = arith.constant 0 : index
    %0 = vector.load %arg4[%c0, %c0_0] : memref<10x64xf32, #tpu.memory_space<vmem>>, vector<10x64xf32>
    %1 = vector.extract_strided_slice %0 {offsets = [0, 0], sizes = [1, 32], strides = [1, 1]} : vector<10x64xf32> to vector<1x32xf32>
    %2 = vector.extract_strided_slice %0 {offsets = [1, 0], sizes = [1, 32], strides = [1, 1]} : vector<10x64xf32> to vector<1x32xf32>
    %3 = vector.extract_strided_slice %0 {offsets = [2, 0], sizes = [1, 32], strides = [1, 1]} : vector<10x64xf32> to vector<1x32xf32>
    %4 = vector.extract_strided_slice %0 {offsets = [3, 0], sizes = [1, 32], strides = [1, 1]} : vector<10x64xf32> to vector<1x32xf32>
    %5 = vector.extract_strided_slice %0 {offsets = [4, 0], sizes = [1, 32], strides = [1, 1]} : vector<10x64xf32> to vector<1x32xf32>
    %6 = vector.extract_strided_slice %0 {offsets = [5, 0], sizes = [1, 32], strides = [1, 1]} : vector<10x64xf32> to vector<1x32xf32>
    %7 = vector.extract_strided_slice %0 {offsets = [6, 0], sizes = [1, 32], strides = [1, 1]} : vector<10x64xf32> to vector<1x32xf32>
    %8 = vector.extract_strided_slice %0 {offsets = [7, 0], sizes = [1, 32], strides = [1, 1]} : vector<10x64xf32> to vector<1x32xf32>
    %9 = vector.extract_strided_slice %0 {offsets = [8, 0], sizes = [1, 32], strides = [1, 1]} : vector<10x64xf32> to vector<1x32xf32>
    %10 = vector.extract_strided_slice %0 {offsets = [9, 0], sizes = [1, 64], strides = [1, 1]} : vector<10x64xf32> to vector<1x64xf32>
    %c0_1 = arith.constant 0 : index
    %c0_2 = arith.constant 0 : index
    %11 = vector.load %arg1[%c0_1, %c0_2] : memref<8x32xf32, #tpu.memory_space<vmem>>, vector<8x32xf32>
    %c0_3 = arith.constant 0 : index
    %c0_4 = arith.constant 0 : index
    %12 = vector.load %arg2[%c0_3, %c0_4] : memref<8x32xf32, #tpu.memory_space<vmem>>, vector<8x32xf32>
    %c0_5 = arith.constant 0 : index
    %c0_6 = arith.constant 0 : index
    %13 = vector.load %arg3[%c0_5, %c0_6] : memref<8x32xf32, #tpu.memory_space<vmem>>, vector<8x32xf32>
    %cst = arith.constant dense<0.000000e+00> : vector<8xf32>
    %14 = vector.multi_reduction <add>, %11, %cst [1] : vector<8x32xf32> to vector<8xf32>
    %15 = vector.shape_cast %14 : vector<8xf32> to vector<8x1xf32>
    %cst_7 = arith.constant 3.200000e+01 : f32
    %16 = vector.broadcast %cst_7 : f32 to vector<8x1xf32>
    %17 = arith.divf %15, %16 : vector<8x1xf32>
    %18 = vector.broadcast %17 : vector<8x1xf32> to vector<8x32xf32>
    %19 = arith.subf %11, %18 : vector<8x32xf32>
    %20 = arith.mulf %19, %19 : vector<8x32xf32>
    %cst_8 = arith.constant dense<0.000000e+00> : vector<8xf32>
    %21 = vector.multi_reduction <add>, %20, %cst_8 [1] : vector<8x32xf32> to vector<8xf32>
    %22 = vector.shape_cast %21 : vector<8xf32> to vector<8x1xf32>
    %cst_9 = arith.constant 3.200000e+01 : f32
    %23 = vector.broadcast %cst_9 : f32 to vector<8x1xf32>
    %24 = arith.divf %22, %23 : vector<8x1xf32>
    %cst_10 = arith.constant 9.99999974E-6 : f32
    %25 = vector.broadcast %cst_10 : f32 to vector<8x1xf32>
    %26 = arith.addf %24, %25 : vector<8x1xf32>
    %27 = math.rsqrt %26 : vector<8x1xf32>
    %28 = vector.broadcast %27 : vector<8x1xf32> to vector<8x32xf32>
    %29 = arith.mulf %19, %28 : vector<8x32xf32>
    %30 = vector.broadcast %5 : vector<1x32xf32> to vector<8x32xf32>
    %31 = arith.mulf %29, %30 : vector<8x32xf32>
    %32 = vector.broadcast %6 : vector<1x32xf32> to vector<8x32xf32>
    %33 = arith.addf %31, %32 : vector<8x32xf32>
    %34 = arith.truncf %33 : vector<8x32xf32> to vector<8x32xbf16>
    %cst_11 = arith.constant dense<0.000000e+00> : vector<8xf32>
    %35 = vector.multi_reduction <add>, %12, %cst_11 [1] : vector<8x32xf32> to vector<8xf32>
    %36 = vector.shape_cast %35 : vector<8xf32> to vector<8x1xf32>
    %cst_12 = arith.constant 3.200000e+01 : f32
    %37 = vector.broadcast %cst_12 : f32 to vector<8x1xf32>
    %38 = arith.divf %36, %37 : vector<8x1xf32>
    %39 = vector.broadcast %38 : vector<8x1xf32> to vector<8x32xf32>
    %40 = arith.subf %12, %39 : vector<8x32xf32>
    %41 = arith.mulf %40, %40 : vector<8x32xf32>
    %cst_13 = arith.constant dense<0.000000e+00> : vector<8xf32>
    %42 = vector.multi_reduction <add>, %41, %cst_13 [1] : vector<8x32xf32> to vector<8xf32>
    %43 = vector.shape_cast %42 : vector<8xf32> to vector<8x1xf32>
    %cst_14 = arith.constant 3.200000e+01 : f32
    %44 = vector.broadcast %cst_14 : f32 to vector<8x1xf32>
    %45 = arith.divf %43, %44 : vector<8x1xf32>
    %cst_15 = arith.constant 9.99999974E-6 : f32
    %46 = vector.broadcast %cst_15 : f32 to vector<8x1xf32>
    %47 = arith.addf %45, %46 : vector<8x1xf32>
    %48 = math.rsqrt %47 : vector<8x1xf32>
    %49 = vector.broadcast %48 : vector<8x1xf32> to vector<8x32xf32>
    %50 = arith.mulf %40, %49 : vector<8x32xf32>
    %51 = vector.broadcast %5 : vector<1x32xf32> to vector<8x32xf32>
    %52 = arith.mulf %50, %51 : vector<8x32xf32>
    %53 = vector.broadcast %6 : vector<1x32xf32> to vector<8x32xf32>
    %54 = arith.addf %52, %53 : vector<8x32xf32>
    %55 = arith.truncf %54 : vector<8x32xf32> to vector<8x32xbf16>
    %cst_16 = arith.constant dense<0.000000e+00> : vector<8xf32>
    %56 = vector.multi_reduction <add>, %13, %cst_16 [1] : vector<8x32xf32> to vector<8xf32>
    %57 = vector.shape_cast %56 : vector<8xf32> to vector<8x1xf32>
    %cst_17 = arith.constant 3.200000e+01 : f32
    %58 = vector.broadcast %cst_17 : f32 to vector<8x1xf32>
    %59 = arith.divf %57, %58 : vector<8x1xf32>
    %60 = vector.broadcast %59 : vector<8x1xf32> to vector<8x32xf32>
    %61 = arith.subf %13, %60 : vector<8x32xf32>
    %62 = arith.mulf %61, %61 : vector<8x32xf32>
    %cst_18 = arith.constant dense<0.000000e+00> : vector<8xf32>
    %63 = vector.multi_reduction <add>, %62, %cst_18 [1] : vector<8x32xf32> to vector<8xf32>
    %64 = vector.shape_cast %63 : vector<8xf32> to vector<8x1xf32>
    %cst_19 = arith.constant 3.200000e+01 : f32
    %65 = vector.broadcast %cst_19 : f32 to vector<8x1xf32>
    %66 = arith.divf %64, %65 : vector<8x1xf32>
    %cst_20 = arith.constant 9.99999974E-6 : f32
    %67 = vector.broadcast %cst_20 : f32 to vector<8x1xf32>
    %68 = arith.addf %66, %67 : vector<8x1xf32>
    %69 = math.rsqrt %68 : vector<8x1xf32>
    %70 = vector.broadcast %69 : vector<8x1xf32> to vector<8x32xf32>
    %71 = arith.mulf %61, %70 : vector<8x32xf32>
    %72 = vector.broadcast %5 : vector<1x32xf32> to vector<8x32xf32>
    %73 = arith.mulf %71, %72 : vector<8x32xf32>
    %74 = vector.broadcast %6 : vector<1x32xf32> to vector<8x32xf32>
    %75 = arith.addf %73, %74 : vector<8x32xf32>
    %76 = arith.truncf %75 : vector<8x32xf32> to vector<8x32xbf16>
    %c0_21 = arith.constant 0 : index
    %c0_22 = arith.constant 0 : index
    %77 = vector.load %arg5[%c0_21, %c0_22] : memref<32x32xbf16, #tpu.memory_space<vmem>>, vector<32x32xbf16>
    %cst_23 = arith.constant dense<0.000000e+00> : vector<8x32xf32>
    %78 = tpu.matmul %34, %77, %cst_23 {dimension_numbers = #tpu.dot_dimension_numbers<[1], [0], [0], [1], [0, 0, 1, 1], [], []>} : vector<8x32xbf16>, vector<32x32xbf16>, vector<8x32xf32> -> vector<8x32xf32>
    %79 = vector.broadcast %1 : vector<1x32xf32> to vector<8x32xf32>
    %80 = arith.addf %78, %79 : vector<8x32xf32>
    %cst_24 = arith.constant 0.353553385 : f32
    %81 = vector.broadcast %cst_24 : f32 to vector<8x32xf32>
    %82 = arith.mulf %80, %81 : vector<8x32xf32>
    %c0_25 = arith.constant 0 : index
    %c0_26 = arith.constant 0 : index
    %83 = vector.load %arg6[%c0_25, %c0_26] : memref<32x32xbf16, #tpu.memory_space<vmem>>, vector<32x32xbf16>
    %cst_27 = arith.constant dense<0.000000e+00> : vector<8x32xf32>
    %84 = tpu.matmul %55, %83, %cst_27 {dimension_numbers = #tpu.dot_dimension_numbers<[1], [0], [0], [1], [0, 0, 1, 1], [], []>} : vector<8x32xbf16>, vector<32x32xbf16>, vector<8x32xf32> -> vector<8x32xf32>
    %85 = vector.broadcast %2 : vector<1x32xf32> to vector<8x32xf32>
    %86 = arith.addf %84, %85 : vector<8x32xf32>
    %c0_28 = arith.constant 0 : index
    %c0_29 = arith.constant 0 : index
    %87 = vector.load %arg7[%c0_28, %c0_29] : memref<32x32xbf16, #tpu.memory_space<vmem>>, vector<32x32xbf16>
    %cst_30 = arith.constant dense<0.000000e+00> : vector<8x32xf32>
    %88 = tpu.matmul %76, %87, %cst_30 {dimension_numbers = #tpu.dot_dimension_numbers<[1], [0], [0], [1], [0, 0, 1, 1], [], []>} : vector<8x32xbf16>, vector<32x32xbf16>, vector<8x32xf32> -> vector<8x32xf32>
    %89 = vector.broadcast %3 : vector<1x32xf32> to vector<8x32xf32>
    %90 = arith.addf %88, %89 : vector<8x32xf32>
    %91 = vector.extract_strided_slice %82 {offsets = [0, 0], sizes = [8, 8], strides = [1, 1]} : vector<8x32xf32> to vector<8x8xf32>
    %92 = arith.truncf %91 : vector<8x8xf32> to vector<8x8xbf16>
    %93 = vector.extract_strided_slice %86 {offsets = [0, 0], sizes = [8, 8], strides = [1, 1]} : vector<8x32xf32> to vector<8x8xf32>
    %94 = arith.truncf %93 : vector<8x8xf32> to vector<8x8xbf16>
    %95 = vector.extract_strided_slice %90 {offsets = [0, 0], sizes = [8, 8], strides = [1, 1]} : vector<8x32xf32> to vector<8x8xf32>
    %96 = arith.truncf %95 : vector<8x8xf32> to vector<8x8xbf16>
    %cst_31 = arith.constant dense<0.000000e+00> : vector<8x8xf32>
    %97 = tpu.matmul %92, %94, %cst_31 {dimension_numbers = #tpu.dot_dimension_numbers<[1], [1], [0], [0], [0, 0, 1, 0], [], []>} : vector<8x8xbf16>, vector<8x8xbf16>, vector<8x8xf32> -> vector<8x8xf32>
    %cst_32 = arith.constant dense<0xFF800000> : vector<8xf32>
    %98 = vector.multi_reduction <maximumf>, %97, %cst_32 [1] : vector<8x8xf32> to vector<8xf32>
    %99 = vector.shape_cast %98 : vector<8xf32> to vector<8x1xf32>
    %100 = vector.broadcast %99 : vector<8x1xf32> to vector<8x8xf32>
    %101 = arith.subf %97, %100 : vector<8x8xf32>
    %102 = math.exp %101 : vector<8x8xf32>
    %cst_33 = arith.constant dense<0.000000e+00> : vector<8xf32>
    %103 = vector.multi_reduction <add>, %102, %cst_33 [1] : vector<8x8xf32> to vector<8xf32>
    %104 = vector.shape_cast %103 : vector<8xf32> to vector<8x1xf32>
    %105 = vector.broadcast %104 : vector<8x1xf32> to vector<8x8xf32>
    %106 = arith.divf %102, %105 : vector<8x8xf32>
    %107 = arith.truncf %106 : vector<8x8xf32> to vector<8x8xbf16>
    %cst_34 = arith.constant dense<0.000000e+00> : vector<8x8xf32>
    %108 = tpu.matmul %107, %96, %cst_34 {dimension_numbers = #tpu.dot_dimension_numbers<[1], [0], [0], [1], [0, 0, 1, 1], [], []>} : vector<8x8xbf16>, vector<8x8xbf16>, vector<8x8xf32> -> vector<8x8xf32>
    %c0_35 = arith.constant 0 : index
    %c0_36 = arith.constant 0 : index
    %109 = vector.load %arg12[%c0_35, %c0_36] : memref<8x32xf32, #tpu.memory_space<vmem>>, vector<8x8xf32>
    tpu.vector_store %arg12[%c0_35, %c0_36], %108 {strides = array<i32>} : memref<8x32xf32, #tpu.memory_space<vmem>>, vector<8x8xf32>,
    %110 = vector.extract_strided_slice %82 {offsets = [0, 8], sizes = [8, 8], strides = [1, 1]} : vector<8x32xf32> to vector<8x8xf32>
    %111 = arith.truncf %110 : vector<8x8xf32> to vector<8x8xbf16>
    %112 = vector.extract_strided_slice %86 {offsets = [0, 8], sizes = [8, 8], strides = [1, 1]} : vector<8x32xf32> to vector<8x8xf32>
    %113 = arith.truncf %112 : vector<8x8xf32> to vector<8x8xbf16>
    %114 = vector.extract_strided_slice %90 {offsets = [0, 8], sizes = [8, 8], strides = [1, 1]} : vector<8x32xf32> to vector<8x8xf32>
    %115 = arith.truncf %114 : vector<8x8xf32> to vector<8x8xbf16>
    %cst_37 = arith.constant dense<0.000000e+00> : vector<8x8xf32>
    %116 = tpu.matmul %111, %113, %cst_37 {dimension_numbers = #tpu.dot_dimension_numbers<[1], [1], [0], [0], [0, 0, 1, 0], [], []>} : vector<8x8xbf16>, vector<8x8xbf16>, vector<8x8xf32> -> vector<8x8xf32>
    %cst_38 = arith.constant dense<0xFF800000> : vector<8xf32>
    %117 = vector.multi_reduction <maximumf>, %116, %cst_38 [1] : vector<8x8xf32> to vector<8xf32>
    %118 = vector.shape_cast %117 : vector<8xf32> to vector<8x1xf32>
    %119 = vector.broadcast %118 : vector<8x1xf32> to vector<8x8xf32>
    %120 = arith.subf %116, %119 : vector<8x8xf32>
    %121 = math.exp %120 : vector<8x8xf32>
    %cst_39 = arith.constant dense<0.000000e+00> : vector<8xf32>
    %122 = vector.multi_reduction <add>, %121, %cst_39 [1] : vector<8x8xf32> to vector<8xf32>
    %123 = vector.shape_cast %122 : vector<8xf32> to vector<8x1xf32>
    %124 = vector.broadcast %123 : vector<8x1xf32> to vector<8x8xf32>
    %125 = arith.divf %121, %124 : vector<8x8xf32>
    %126 = arith.truncf %125 : vector<8x8xf32> to vector<8x8xbf16>
    %cst_40 = arith.constant dense<0.000000e+00> : vector<8x8xf32>
    %127 = tpu.matmul %126, %115, %cst_40 {dimension_numbers = #tpu.dot_dimension_numbers<[1], [0], [0], [1], [0, 0, 1, 1], [], []>} : vector<8x8xbf16>, vector<8x8xbf16>, vector<8x8xf32> -> vector<8x8xf32>
    %c0_41 = arith.constant 0 : index
    %c8 = arith.constant 8 : index
    %128 = vector.load %arg12[%c0_41, %c8] : memref<8x32xf32, #tpu.memory_space<vmem>>, vector<8x8xf32>
    tpu.vector_store %arg12[%c0_41, %c8], %127 {strides = array<i32>} : memref<8x32xf32, #tpu.memory_space<vmem>>, vector<8x8xf32>,
    %129 = vector.extract_strided_slice %82 {offsets = [0, 16], sizes = [8, 8], strides = [1, 1]} : vector<8x32xf32> to vector<8x8xf32>
    %130 = arith.truncf %129 : vector<8x8xf32> to vector<8x8xbf16>
    %131 = vector.extract_strided_slice %86 {offsets = [0, 16], sizes = [8, 8], strides = [1, 1]} : vector<8x32xf32> to vector<8x8xf32>
    %132 = arith.truncf %131 : vector<8x8xf32> to vector<8x8xbf16>
    %133 = vector.extract_strided_slice %90 {offsets = [0, 16], sizes = [8, 8], strides = [1, 1]} : vector<8x32xf32> to vector<8x8xf32>
    %134 = arith.truncf %133 : vector<8x8xf32> to vector<8x8xbf16>
    %cst_42 = arith.constant dense<0.000000e+00> : vector<8x8xf32>
    %135 = tpu.matmul %130, %132, %cst_42 {dimension_numbers = #tpu.dot_dimension_numbers<[1], [1], [0], [0], [0, 0, 1, 0], [], []>} : vector<8x8xbf16>, vector<8x8xbf16>, vector<8x8xf32> -> vector<8x8xf32>
    %cst_43 = arith.constant dense<0xFF800000> : vector<8xf32>
    %136 = vector.multi_reduction <maximumf>, %135, %cst_43 [1] : vector<8x8xf32> to vector<8xf32>
    %137 = vector.shape_cast %136 : vector<8xf32> to vector<8x1xf32>
    %138 = vector.broadcast %137 : vector<8x1xf32> to vector<8x8xf32>
    %139 = arith.subf %135, %138 : vector<8x8xf32>
    %140 = math.exp %139 : vector<8x8xf32>
    %cst_44 = arith.constant dense<0.000000e+00> : vector<8xf32>
    %141 = vector.multi_reduction <add>, %140, %cst_44 [1] : vector<8x8xf32> to vector<8xf32>
    %142 = vector.shape_cast %141 : vector<8xf32> to vector<8x1xf32>
    %143 = vector.broadcast %142 : vector<8x1xf32> to vector<8x8xf32>
    %144 = arith.divf %140, %143 : vector<8x8xf32>
    %145 = arith.truncf %144 : vector<8x8xf32> to vector<8x8xbf16>
    %cst_45 = arith.constant dense<0.000000e+00> : vector<8x8xf32>
    %146 = tpu.matmul %145, %134, %cst_45 {dimension_numbers = #tpu.dot_dimension_numbers<[1], [0], [0], [1], [0, 0, 1, 1], [], []>} : vector<8x8xbf16>, vector<8x8xbf16>, vector<8x8xf32> -> vector<8x8xf32>
    %c0_46 = arith.constant 0 : index
    %c16 = arith.constant 16 : index
    %147 = vector.load %arg12[%c0_46, %c16] : memref<8x32xf32, #tpu.memory_space<vmem>>, vector<8x8xf32>
    tpu.vector_store %arg12[%c0_46, %c16], %146 {strides = array<i32>} : memref<8x32xf32, #tpu.memory_space<vmem>>, vector<8x8xf32>,
    %148 = vector.extract_strided_slice %82 {offsets = [0, 24], sizes = [8, 8], strides = [1, 1]} : vector<8x32xf32> to vector<8x8xf32>
    %149 = arith.truncf %148 : vector<8x8xf32> to vector<8x8xbf16>
    %150 = vector.extract_strided_slice %86 {offsets = [0, 24], sizes = [8, 8], strides = [1, 1]} : vector<8x32xf32> to vector<8x8xf32>
    %151 = arith.truncf %150 : vector<8x8xf32> to vector<8x8xbf16>
    %152 = vector.extract_strided_slice %90 {offsets = [0, 24], sizes = [8, 8], strides = [1, 1]} : vector<8x32xf32> to vector<8x8xf32>
    %153 = arith.truncf %152 : vector<8x8xf32> to vector<8x8xbf16>
    %cst_47 = arith.constant dense<0.000000e+00> : vector<8x8xf32>
    %154 = tpu.matmul %149, %151, %cst_47 {dimension_numbers = #tpu.dot_dimension_numbers<[1], [1], [0], [0], [0, 0, 1, 0], [], []>} : vector<8x8xbf16>, vector<8x8xbf16>, vector<8x8xf32> -> vector<8x8xf32>
    %cst_48 = arith.constant dense<0xFF800000> : vector<8xf32>
    %155 = vector.multi_reduction <maximumf>, %154, %cst_48 [1] : vector<8x8xf32> to vector<8xf32>
    %156 = vector.shape_cast %155 : vector<8xf32> to vector<8x1xf32>
    %157 = vector.broadcast %156 : vector<8x1xf32> to vector<8x8xf32>
    %158 = arith.subf %154, %157 : vector<8x8xf32>
    %159 = math.exp %158 : vector<8x8xf32>
    %cst_49 = arith.constant dense<0.000000e+00> : vector<8xf32>
    %160 = vector.multi_reduction <add>, %159, %cst_49 [1] : vector<8x8xf32> to vector<8xf32>
    %161 = vector.shape_cast %160 : vector<8xf32> to vector<8x1xf32>
    %162 = vector.broadcast %161 : vector<8x1xf32> to vector<8x8xf32>
    %163 = arith.divf %159, %162 : vector<8x8xf32>
    %164 = arith.truncf %163 : vector<8x8xf32> to vector<8x8xbf16>
    %cst_50 = arith.constant dense<0.000000e+00> : vector<8x8xf32>
    %165 = tpu.matmul %164, %153, %cst_50 {dimension_numbers = #tpu.dot_dimension_numbers<[1], [0], [0], [1], [0, 0, 1, 1], [], []>} : vector<8x8xbf16>, vector<8x8xbf16>, vector<8x8xf32> -> vector<8x8xf32>
    %c0_51 = arith.constant 0 : index
    %c24 = arith.constant 24 : index
    %166 = vector.load %arg12[%c0_51, %c24] : memref<8x32xf32, #tpu.memory_space<vmem>>, vector<8x8xf32>
    tpu.vector_store %arg12[%c0_51, %c24], %165 {strides = array<i32>} : memref<8x32xf32, #tpu.memory_space<vmem>>, vector<8x8xf32>,
    %c0_52 = arith.constant 0 : index
    %c0_53 = arith.constant 0 : index
    %167 = vector.load %arg12[%c0_52, %c0_53] : memref<8x32xf32, #tpu.memory_space<vmem>>, vector<8x32xf32>
    %168 = arith.truncf %167 : vector<8x32xf32> to vector<8x32xbf16>
    %c0_54 = arith.constant 0 : index
    %c0_55 = arith.constant 0 : index
    %169 = vector.load %arg8[%c0_54, %c0_55] : memref<32x32xbf16, #tpu.memory_space<vmem>>, vector<32x32xbf16>
    %cst_56 = arith.constant dense<0.000000e+00> : vector<8x32xf32>
    %170 = tpu.matmul %168, %169, %cst_56 {dimension_numbers = #tpu.dot_dimension_numbers<[1], [0], [0], [1], [0, 0, 1, 1], [], []>} : vector<8x32xbf16>, vector<32x32xbf16>, vector<8x32xf32> -> vector<8x32xf32>
    %171 = vector.broadcast %4 : vector<1x32xf32> to vector<8x32xf32>
    %172 = arith.addf %170, %171 : vector<8x32xf32>
    %173 = arith.addf %13, %172 : vector<8x32xf32>
    %cst_57 = arith.constant dense<0.000000e+00> : vector<8xf32>
    %174 = vector.multi_reduction <add>, %173, %cst_57 [1] : vector<8x32xf32> to vector<8xf32>
    %175 = vector.shape_cast %174 : vector<8xf32> to vector<8x1xf32>
    %cst_58 = arith.constant 3.200000e+01 : f32
    %176 = vector.broadcast %cst_58 : f32 to vector<8x1xf32>
    %177 = arith.divf %175, %176 : vector<8x1xf32>
    %178 = vector.broadcast %177 : vector<8x1xf32> to vector<8x32xf32>
    %179 = arith.subf %173, %178 : vector<8x32xf32>
    %180 = arith.mulf %179, %179 : vector<8x32xf32>
    %cst_59 = arith.constant dense<0.000000e+00> : vector<8xf32>
    %181 = vector.multi_reduction <add>, %180, %cst_59 [1] : vector<8x32xf32> to vector<8xf32>
    %182 = vector.shape_cast %181 : vector<8xf32> to vector<8x1xf32>
    %cst_60 = arith.constant 3.200000e+01 : f32
    %183 = vector.broadcast %cst_60 : f32 to vector<8x1xf32>
    %184 = arith.divf %182, %183 : vector<8x1xf32>
    %cst_61 = arith.constant 9.99999974E-6 : f32
    %185 = vector.broadcast %cst_61 : f32 to vector<8x1xf32>
    %186 = arith.addf %184, %185 : vector<8x1xf32>
    %187 = math.rsqrt %186 : vector<8x1xf32>
    %188 = vector.broadcast %187 : vector<8x1xf32> to vector<8x32xf32>
    %189 = arith.mulf %179, %188 : vector<8x32xf32>
    %190 = vector.broadcast %5 : vector<1x32xf32> to vector<8x32xf32>
    %191 = arith.mulf %189, %190 : vector<8x32xf32>
    %192 = vector.broadcast %6 : vector<1x32xf32> to vector<8x32xf32>
    %193 = arith.addf %191, %192 : vector<8x32xf32>
    %194 = arith.truncf %193 : vector<8x32xf32> to vector<8x32xbf16>
    %c0_62 = arith.constant 0 : index
    %c0_63 = arith.constant 0 : index
    %195 = vector.load %arg9[%c0_62, %c0_63] : memref<32x64xbf16, #tpu.memory_space<vmem>>, vector<32x64xbf16>
    %cst_64 = arith.constant dense<0.000000e+00> : vector<8x64xf32>
    %196 = tpu.matmul %194, %195, %cst_64 {dimension_numbers = #tpu.dot_dimension_numbers<[1], [0], [0], [1], [0, 0, 1, 1], [], []>} : vector<8x32xbf16>, vector<32x64xbf16>, vector<8x64xf32> -> vector<8x64xf32>
    %197 = vector.broadcast %10 : vector<1x64xf32> to vector<8x64xf32>
    %198 = arith.addf %196, %197 : vector<8x64xf32>
    %cst_65 = arith.constant 0.000000e+00 : f32
    %199 = vector.broadcast %cst_65 : f32 to vector<8x64xf32>
    %200 = arith.maximumf %198, %199 : vector<8x64xf32>
    %201 = arith.truncf %200 : vector<8x64xf32> to vector<8x64xbf16>
    %c0_66 = arith.constant 0 : index
    %c0_67 = arith.constant 0 : index
    %202 = vector.load %arg10[%c0_66, %c0_67] : memref<64x32xbf16, #tpu.memory_space<vmem>>, vector<64x32xbf16>
    %cst_68 = arith.constant dense<0.000000e+00> : vector<8x32xf32>
    %203 = tpu.matmul %201, %202, %cst_68 {dimension_numbers = #tpu.dot_dimension_numbers<[1], [0], [0], [1], [0, 0, 1, 1], [], []>} : vector<8x64xbf16>, vector<64x32xbf16>, vector<8x32xf32> -> vector<8x32xf32>
    %204 = vector.broadcast %9 : vector<1x32xf32> to vector<8x32xf32>
    %205 = arith.addf %203, %204 : vector<8x32xf32>
    %206 = arith.addf %193, %205 : vector<8x32xf32>
    %cst_69 = arith.constant dense<0.000000e+00> : vector<8xf32>
    %207 = vector.multi_reduction <add>, %206, %cst_69 [1] : vector<8x32xf32> to vector<8xf32>
    %208 = vector.shape_cast %207 : vector<8xf32> to vector<8x1xf32>
    %cst_70 = arith.constant 3.200000e+01 : f32
    %209 = vector.broadcast %cst_70 : f32 to vector<8x1xf32>
    %210 = arith.divf %208, %209 : vector<8x1xf32>
    %211 = vector.broadcast %210 : vector<8x1xf32> to vector<8x32xf32>
    %212 = arith.subf %206, %211 : vector<8x32xf32>
    %213 = arith.mulf %212, %212 : vector<8x32xf32>
    %cst_71 = arith.constant dense<0.000000e+00> : vector<8xf32>
    %214 = vector.multi_reduction <add>, %213, %cst_71 [1] : vector<8x32xf32> to vector<8xf32>
    %215 = vector.shape_cast %214 : vector<8xf32> to vector<8x1xf32>
    %cst_72 = arith.constant 3.200000e+01 : f32
    %216 = vector.broadcast %cst_72 : f32 to vector<8x1xf32>
    %217 = arith.divf %215, %216 : vector<8x1xf32>
    %cst_73 = arith.constant 9.99999974E-6 : f32
    %218 = vector.broadcast %cst_73 : f32 to vector<8x1xf32>
    %219 = arith.addf %217, %218 : vector<8x1xf32>
    %220 = math.rsqrt %219 : vector<8x1xf32>
    %221 = vector.broadcast %220 : vector<8x1xf32> to vector<8x32xf32>
    %222 = arith.mulf %212, %221 : vector<8x32xf32>
    %223 = vector.broadcast %7 : vector<1x32xf32> to vector<8x32xf32>
    %224 = arith.mulf %222, %223 : vector<8x32xf32>
    %225 = vector.broadcast %8 : vector<1x32xf32> to vector<8x32xf32>
    %226 = arith.addf %224, %225 : vector<8x32xf32>
    %c0_74 = arith.constant 0 : index
    %c0_75 = arith.constant 0 : index
    %227 = vector.load %arg11[%c0_74, %c0_75] : memref<8x32xf32, #tpu.memory_space<vmem>>, vector<8x32xf32>
    tpu.vector_store %arg11[%c0_74, %c0_75], %226 {strides = array<i32>} : memref<8x32xf32, #tpu.memory_space<vmem>>, vector<8x32xf32>,
    return
  }
  func.func @transform_0(%arg0: i32) -> (i32, i32) {
    %c0_i32 = arith.constant 0 : i32
    %c0_i32_0 = arith.constant 0 : i32
    return %arg0, %c0_i32 : i32, i32
  }
  func.func @transform_1(%arg0: i32) -> (i32, i32) {
    %c0_i32 = arith.constant 0 : i32
    %c0_i32_0 = arith.constant 0 : i32
    return %arg0, %c0_i32 : i32, i32
  }
  func.func @transform_2(%arg0: i32) -> (i32, i32) {
    %c0_i32 = arith.constant 0 : i32
    %c0_i32_0 = arith.constant 0 : i32
    return %arg0, %c0_i32 : i32, i32
  }
  func.func @transform_3(%arg0: i32) -> (i32, i32) {
    %c0_i32 = arith.constant 0 : i32
    %c0_i32_0 = arith.constant 0 : i32
    %c0_i32_1 = arith.constant 0 : i32
    return %c0_i32, %c0_i32_0 : i32, i32
  }
  func.func @transform_4(%arg0: i32) -> (i32, i32) {
    %c0_i32 = arith.constant 0 : i32
    %c0_i32_0 = arith.constant 0 : i32
    %c0_i32_1 = arith.constant 0 : i32
    return %c0_i32, %c0_i32_0 : i32, i32
  }
  func.func @transform_5(%arg0: i32) -> (i32, i32) {
    %c0_i32 = arith.constant 0 : i32
    %c0_i32_0 = arith.constant 0 : i32
    %c0_i32_1 = arith.constant 0 : i32
    return %c0_i32, %c0_i32_0 : i32, i32
  }
  func.func @transform_6(%arg0: i32) -> (i32, i32) {
    %c0_i32 = arith.constant 0 : i32
    %c0_i32_0 = arith.constant 0 : i32
    %c0_i32_1 = arith.constant 0 : i32
    return %c0_i32, %c0_i32_0 : i32, i32
  }
  func.func @transform_7(%arg0: i32) -> (i32, i32) {
    %c0_i32 = arith.constant 0 : i32
    %c0_i32_0 = arith.constant 0 : i32
    %c0_i32_1 = arith.constant 0 : i32
    return %c0_i32, %c0_i32_0 : i32, i32
  }
  func.func @transform_8(%arg0: i32) -> (i32, i32) {
    %c0_i32 = arith.constant 0 : i32
    %c0_i32_0 = arith.constant 0 : i32
    %c0_i32_1 = arith.constant 0 : i32
    return %c0_i32, %c0_i32_0 : i32, i32
  }
  func.func @transform_9(%arg0: i32) -> (i32, i32) {
    %c0_i32 = arith.constant 0 : i32
    %c0_i32_0 = arith.constant 0 : i32
    %c0_i32_1 = arith.constant 0 : i32
    return %c0_i32, %c0_i32_0 : i32, i32
  }
  func.func @transform_10(%arg0: i32) -> (i32, i32) {
    %c0_i32 = arith.constant 0 : i32
    %c0_i32_0 = arith.constant 0 : i32
    return %arg0, %c0_i32 : i32, i32
  }
}

</mosaic_0001>

<bundles_post_ra>
// kernel: tpu_custom_call.1
= control target key start
LH: loop header
LB: loop body
LE: loop exit
PB: predicated region body
PF: predicated region fallthrough
CT: control target
= control target key end

     0   :  { %s2708_s0 = inlined_call_operand.vmem [shape: f32[16,32], index: 0, kind: input, shape index: {}]   ;;  %s2709_s1 = inlined_call_operand.vmem [shape: f32[16,32], index: 1, kind: input, shape index: {}]   ;;  %s2710_s2 = inlined_call_operand.vmem [shape: f32[16,32], index: 2, kind: input, shape index: {}]   ;;  %s2711_s3 = inlined_call_operand.hbm [shape: f32[10,64], index: 3, kind: input, shape index: {}]   ;;  %s2712_s4 = inlined_call_operand.hbm [shape: bf16[32,32], index: 4, kind: input, shape index: {}]   ;;  %s2713_s5 = inlined_call_operand.hbm [shape: bf16[32,32], index: 5, kind: input, shape index: {}]   ;;  %s2714_s6 = inlined_call_operand.hbm [shape: bf16[32,32], index: 6, kind: input, shape index: {}]   ;;  %s2715_s7 = inlined_call_operand.hbm [shape: bf16[32,32], index: 7, kind: input, shape index: {}]   ;;  %s2716_s8 = inlined_call_operand.hbm [shape: bf16[32,64], index: 8, kind: input, shape index: {}]   ;;  %s2717_s9 = inlined_call_operand.vmem [shape: bf16[64,32], index: 9, kind: input, shape index: {}]   ;;  %s2718_s10 = inlined_call_operand.hbm [shape: f32[16,32], index: 10, kind: output, shape index: {}]  }
   0x1   :  { %2732 = sst [smem:[#allocation26_spill]] %s2712_s4 }
   0x2   :  { %2733 = sst [smem:[#allocation27_spill]] %s2714_s6 }
   0x3   :  { %15 = vsyncpa [#allocation4], 0 }
   0x4   :  { %16 = vsyncpa [#allocation7], 0 }
   0x5   :  { %17 = vsyncpa [#allocation10], 0 }
   0x6   :  { %18 = vsyncpa [#allocation13], 0 }
   0x7   :  { %19 = vsyncpa [#allocation5], 0 }
   0x8   :  { %21 = vsyncpa [#allocation5 + $0x1], 0  ;;  %s2263_s13 = smov 0   ;;  %s2265_s14 = smov 0  }
   0x9   :  { %s2267_s15 = smov 0   ;;  %s2269_s16 = smov 0  }
   0xa LB: > { %2734 = sst [smem:[#allocation20_spill]] %s2175_s13  ;;  %s2284_s17 = sadd.s32 4294967295, %s2187_s16   ;;  %s2187_s16 = sphi %s2269_s16, %s2763_s16   ;;  %s2183_s15 = sphi %s2267_s15, %s2765_s15   ;;  %s2179_s14 = sphi %s2265_s14, %s2767_s14   ;;  %s2175_s13 = sphi %s2263_s13, %s2766_s13  }
   0xb   : > { %2735 = sst [smem:[#allocation21_spill]] %s2183_s15  ;;  %s1601_s18 = sadd.s32 4294967294, %s2187_s16  }
   0xc   : > { %2736 = sst [smem:[#allocation22_spill]] %s2187_s16  ;;  %s2288_s19 = sadd.s32 1, %s2187_s16  }
   0xd   : > { %2737 = sst [smem:[#allocation23_spill]] %s2288_s19  ;;  %s259_s20 = sadd.s32 1, %s2183_s15 }
   0xe   : > { %s256_s21 = ssub.s32 %s2187_s16, %s2288_s19  ;;  %p269_p0 = scmp.ne.s32.totalorder %s2183_s15, %s2179_s14 }
   0xf   : > { %p257_p1 = scmp.eq.s32.totalorder %s256_s21, 0  ;;  %p270_p2 = scmp.eq.s32.totalorder %s2284_s17, 1 }
  0x10   : > { %p275_p3 = scmp.ne.s32.totalorder %s2179_s14, %s2175_s13  ;;  %p276_p4 = scmp.eq.s32.totalorder %s1601_s18, 1 }
  0x11   : > { %s2299_s22 = scalar_select %p257_p1, %s2183_s15, %s259_s20  }
  0x12   : > { %p2301_p5 = por %p270_p2, %p269_p0  ;;  %p2305_p6 = por %p276_p4, %p275_p3 }
  0x13   : > { %2738 = sst [smem:[#allocation24_spill]] %s2299_s22  ;;  %p1602_p7 = scmp.ge.s32.totalorder %s2187_s16, 1 }
  0x14   : > { %s2739_s23 = scalar_select %p2301_p5, 1, 0 }
  0x15   : > { %s2740_s24 = scalar_select %p2305_p6, 1, 0 }
  0x16   : > { %p283_p8 = scmp.lt.s32.totalorder %s2187_s16, 3  ;;  %p2720_p9 = scmp.eq.s32.totalorder %s2284_s17, 0 }
  0x17   : > { %2741 = sst [smem:[#allocation25_spill]] %s2740_s24  ;;  %s2189_s26 = smov [#allocation6]  }
  0x18   : > { %p2312_p10 = pnand %p1602_p7, %p283_p8  ;;  %s308_s27 = sshll.u32 %s2189_s26, 4  ;;  %s2318_s27 = int_to_ptr.vmem [resolvable:$true] %s308_s27 }
  0x19   : > { %s2190_s29 = smov [#allocation9]   ;;  %s2191_s11 = smov [#allocation3]  }
  0x1a   : > { %s2742_s25 = scalar_select %p2312_p10, 1, 0 }
  0x1b   : > { %p1815_p11 = pneg %p2312_p10  ;;  %s334_s30 = sshll.u32 %s2190_s29, 4  ;;  %s2326_s30 = int_to_ptr.vmem [resolvable:$true] %s334_s30 }
  0x1c   : > { %s2328_s12 = sshll.u32 %s2191_s11, 4  ;;  %s2744_s4 = sld [smem:[#allocation26_spill]]  ;;  %s296_s12 = int_to_ptr.vmem [resolvable:$true] %s2328_s12 }
  0x1d   : > { %p2322_p12 = pnand %p2720_p9, %p1815_p11 }
  0x1f   : > { %p2338_p0 = pneg %p2322_p12 }
  0x22   : > { %s1941_s21 = scalar_lea.hbm %s2744_s4, 256 }
  0x23   : > { %p1942_p13 = scmp.ne.s32.totalorder %s2744_s4, %s1941_s21  ;;  %p1948_p3 = scmp.lt.u32.totalorder %s1941_s21, %s2744_s4 }
  0x25   : > { %p1944_p1 = pnand %p2338_p0, %p1942_p13 }
  0x27   : > { %p1945_p2 = pneg %p1944_p1 }
  0x29   : > { %p1950_p4 = pnand %p1948_p3, %p1945_p2 }
  0x2b   : > { %1953 = shalt.err (!%p1950_p4)
}
  0x2c   : > { %s1954_s22 = scalar_lea.vmem %s2318_s27, 256  ;;  %p1962_p9 = scmp.lt.s32.totalorder %s2318_s27, %s2318_s27 }
  0x2d   : > { %p1955_p7 = scmp.ne.s32.totalorder %s2318_s27, %s1954_s22  ;;  %p1963_p6 = scmp.lt.s32.totalorder %s1954_s22, %s1954_s22 }
  0x2f   : > { %p1957_p8 = pnand %p1955_p7, %p2338_p0  ;;  %p1964_p13 = por %p1963_p6, %p1962_p9 }
  0x31   : > { %p1958_p11 = pneg %p1957_p8 }
  0x33   : > { %p1965_p1 = pnand %p1964_p13, %p1958_p11 }
  0x35   : > { %1968 = shalt.err (!%p1965_p1)
}
  0x36   : > { %s2728_s18 = smov 64   ;;  %s2730_s20 = smov 4  }
  0x37   : > { %1821 = dma.hbm_to_vmem [thread:$0]  (!%p2322_p12), %s2744_s4, 256, %s2318_s27, [#allocation7], %s2728_s18, %s2728_s18, %s2730_s20  }
  0x38   : > { %s2746_s6 = sld [smem:[#allocation27_spill]] }
  0x3e   : > { %s1969_s22 = scalar_lea.hbm %s2746_s6, 256 }
  0x3f   : > { %p1970_p6 = scmp.ne.s32.totalorder %s2746_s6, %s1969_s22  ;;  %p1976_p3 = scmp.lt.u32.totalorder %s1969_s22, %s2746_s6 }
  0x41   : > { %p1972_p9 = pnand %p1970_p6, %p2338_p0 }
  0x43   : > { %p1973_p2 = pneg %p1972_p9 }
  0x45   : > { %p1978_p4 = pnand %p1976_p3, %p1973_p2 }
  0x47   : > { %1981 = shalt.err (!%p1978_p4)
}
  0x48   : > { %s1982_s27 = scalar_lea.vmem %s2326_s30, 256  ;;  %p1990_p13 = scmp.lt.s32.totalorder %s2326_s30, %s2326_s30 }
  0x49   : > { %p1983_p7 = scmp.ne.s32.totalorder %s2326_s30, %s1982_s27  ;;  %p1991_p1 = scmp.lt.s32.totalorder %s1982_s27, %s1982_s27 }
  0x4b   : > { %p1985_p8 = pnand %p1983_p7, %p2338_p0  ;;  %p1992_p6 = por %p1991_p1, %p1990_p13 }
  0x4d   : > { %p1986_p11 = pneg %p1985_p8 }
  0x4f   : > { %p1993_p9 = pnand %p1992_p6, %p1986_p11 }
  0x51   : > { %1996 = shalt.err (!%p1993_p9)
}
  0x52   : > { %1827 = dma.hbm_to_vmem [thread:$0]  (!%p2322_p12), %s2746_s6, 256, %s2326_s30, [#allocation10], %s2728_s18, %s2728_s18, %s2730_s20  }
  0x53   : > { %s1997_s21 = scalar_lea.hbm %s2711_s3, 256 }
  0x54   : > { %p1998_p2 = scmp.ne.s32.totalorder %s2711_s3, %s1997_s21  ;;  %p2004_p7 = scmp.lt.u32.totalorder %s1997_s21, %s2711_s3 }
  0x56   : > { %p2000_p3 = pnand %p1998_p2, %p2338_p0 }
  0x58   : > { %p2001_p4 = pneg %p2000_p3 }
  0x5a   : > { %p2006_p8 = pnand %p2004_p7, %p2001_p4 }
  0x5c   : > { %2009 = shalt.err (!%p2006_p8)
}
  0x5d   : > { %s2010_s27 = scalar_lea.vmem %s296_s12, 256  ;;  %p2018_p6 = scmp.lt.s32.totalorder %s296_s12, %s296_s12 }
  0x5e   : > { %p2011_p11 = scmp.ne.s32.totalorder %s296_s12, %s2010_s27  ;;  %p2019_p9 = scmp.lt.s32.totalorder %s2010_s27, %s2010_s27 }
  0x60   : > { %p2013_p13 = pnand %p2011_p11, %p2338_p0  ;;  %p2020_p5 = por %p2019_p9, %p2018_p6 }
  0x62   : > { %p2014_p1 = pneg %p2013_p13 }
  0x64   : > { %p2021_p10 = pnand %p2020_p5, %p2014_p1 }
  0x66   : > { %2024 = shalt.err (!%p2021_p10)
}
  0x67   : > { %s2194_s30 = smov 128   ;;  %s2195_s13 = smov 8  }
  0x68   : > { %1818 = dma.hbm_to_vmem [thread:$0]  (!%p2322_p12), %s2711_s3, 256, %s296_s12, [#allocation4], %s2194_s30, %s2194_s30, %s2195_s13  }
  0x69   : > { %s2196_s24 = smov [#allocation8]   ;;  %s2197_s26 = smov [#allocation11]  }
  0x6a   : > { %s321_s21 = sshll.u32 %s2196_s24, 4  ;;  %s347_s29 = sshll.u32 %s2197_s26, 4  ;;  %s322_s21 = int_to_ptr.vmem [resolvable:$true] %s321_s21  ;;  %s348_s29 = int_to_ptr.vmem [resolvable:$true] %s347_s29 }
  0x6b   : > { %s2025_s27 = scalar_lea.hbm %s2713_s5, 256 }
  0x6c   : > { %p2026_p5 = scmp.ne.s32.totalorder %s2713_s5, %s2025_s27  ;;  %p2032_p3 = scmp.lt.u32.totalorder %s2025_s27, %s2713_s5 }
  0x6e   : > { %p2028_p10 = pnand %p2026_p5, %p2338_p0 }
  0x70   : > { %p2029_p2 = pneg %p2028_p10 }
  0x72   : > { %p2034_p4 = pnand %p2032_p3, %p2029_p2 }
  0x74   : > { %2037 = shalt.err (!%p2034_p4)
}
  0x75   : > { %s2038_s12 = scalar_lea.vmem %s322_s21, 256  ;;  %p2046_p13 = scmp.lt.s32.totalorder %s322_s21, %s322_s21 }
  0x76   : > { %p2039_p7 = scmp.ne.s32.totalorder %s322_s21, %s2038_s12  ;;  %p2047_p1 = scmp.lt.s32.totalorder %s2038_s12, %s2038_s12 }
  0x78   : > { %p2041_p8 = pnand %p2039_p7, %p2338_p0  ;;  %p2048_p6 = por %p2047_p1, %p2046_p13 }
  0x7a   : > { %p2042_p11 = pneg %p2041_p8 }
  0x7c   : > { %p2049_p9 = pnand %p2048_p6, %p2042_p11 }
  0x7e   : > { %2052 = shalt.err (!%p2049_p9)
}
  0x7f   : > { %s2747_s18 = smov 4   ;;  %s2748_s20 = smov 64  }
  0x80   : > { %1824 = dma.hbm_to_vmem [thread:$0]  (!%p2322_p12), %s2713_s5, 256, %s322_s21, [#allocation7], %s2748_s20, %s2748_s20, %s2747_s18  }
  0x81   : > { %s2053_s16 = scalar_lea.hbm %s2715_s7, 256 }
  0x82   : > { %p2054_p5 = scmp.ne.s32.totalorder %s2715_s7, %s2053_s16  ;;  %p2060_p3 = scmp.lt.u32.totalorder %s2053_s16, %s2715_s7 }
  0x84   : > { %p2056_p10 = pnand %p2054_p5, %p2338_p0 }
  0x86   : > { %p2057_p2 = pneg %p2056_p10 }
  0x88   : > { %p2062_p4 = pnand %p2060_p3, %p2057_p2 }
  0x8a   : > { %2065 = shalt.err (!%p2062_p4)
}
  0x8b   : > { %s2066_s22 = scalar_lea.vmem %s348_s29, 256  ;;  %p2074_p13 = scmp.lt.s32.totalorder %s348_s29, %s348_s29 }
  0x8c   : > { %p2067_p7 = scmp.ne.s32.totalorder %s348_s29, %s2066_s22  ;;  %p2075_p1 = scmp.lt.s32.totalorder %s2066_s22, %s2066_s22 }
  0x8e   : > { %p2069_p8 = pnand %p2067_p7, %p2338_p0  ;;  %p2076_p6 = por %p2075_p1, %p2074_p13 }
  0x90   : > { %p2070_p11 = pneg %p2069_p8 }
  0x92   : > { %p2077_p9 = pnand %p2076_p6, %p2070_p11 }
  0x94   : > { %2080 = shalt.err (!%p2077_p9)
}
  0x95   : > { %1830 = dma.hbm_to_vmem [thread:$0]  (!%p2322_p12), %s2715_s7, 256, %s348_s29, [#allocation10], %s2748_s20, %s2748_s20, %s2747_s18  }
  0x96   : > { %s2198_s12 = smov [#allocation12]   ;;  %s2081_s13 = scalar_lea.hbm %s2716_s8, 256 }
  0x97   : > { %s360_s4 = sshll.u32 %s2198_s12, 4  ;;  %p2082_p5 = scmp.ne.s32.totalorder %s2716_s8, %s2081_s13  ;;  %s361_s4 = int_to_ptr.vmem [resolvable:$true] %s360_s4 }
  0x98   : > { %p2088_p3 = scmp.lt.u32.totalorder %s2081_s13, %s2716_s8 }
  0x99   : > { %p2084_p10 = pnand %p2082_p5, %p2338_p0 }
  0x9b   : > { %p2085_p2 = pneg %p2084_p10 }
  0x9d   : > { %p2090_p4 = pnand %p2088_p3, %p2085_p2 }
  0x9f   : > { %2093 = shalt.err (!%p2090_p4)
}
  0xa0   : > { %s2094_s29 = scalar_lea.vmem %s361_s4, 256  ;;  %p2102_p13 = scmp.lt.s32.totalorder %s361_s4, %s361_s4 }
  0xa1   : > { %p2095_p7 = scmp.ne.s32.totalorder %s361_s4, %s2094_s29  ;;  %p2103_p1 = scmp.lt.s32.totalorder %s2094_s29, %s2094_s29 }
  0xa3   : > { %p2097_p8 = pnand %p2095_p7, %p2338_p0  ;;  %p2104_p6 = por %p2103_p1, %p2102_p13 }
  0xa5   : > { %p2098_p11 = pneg %p2097_p8 }
  0xa7   : > { %p2105_p9 = pnand %p2104_p6, %p2098_p11 }
  0xa9   : > { %2108 = shalt.err (!%p2105_p9)
}
  0xaa   : > { %1833 = dma.hbm_to_vmem [thread:$0]  (!%p2322_p12), %s2716_s8, 256, %s361_s4, [#allocation13], %s2748_s20, %s2748_s20, %s2747_s18  }
  0xab   : > { %p2749_p5 = scmp.ne.s32.totalorder %s2742_s25, 0 }
  0xac   : > { %p2750_p0 = scmp.eq.s32.totalorder (!%p2749_p5), %s2284_s17, 0 }
  0xad   : > { %400 = sbr.rel (%p2749_p5) target bundleno = 3061 (0xbf5), region = 60 }
  0xb4   : > { %2154 = dma.done.wait (%p2750_p0), [#allocation4], 256   ;;  %p2751_p10 = pmov %p2750_p0 }
  0xb5   : > { %p2752_p2 = pmov %p2750_p0 }
  0xb6   : > { %2156 = vsyncadd (%p2751_p10), [#allocation4], 4294967040 }
  0xb7   : > { %2158 = dma.done.wait (%p2752_p2), [#allocation7], 512   ;;  %p2753_p3 = pmov %p2750_p0 }
  0xb8   : > { %p2754_p4 = pmov %p2750_p0 }
  0xb9   : > { %2160 = vsyncadd (%p2753_p3), [#allocation7], 4294966784 }
  0xba   : > { %2162 = dma.done.wait (%p2754_p4), [#allocation10], 512   ;;  %p2755_p12 = pmov %p2750_p0 }
  0xbb   : > { %p2756_p7 = pmov %p2750_p0 }
  0xbc   : > { %2164 = vsyncadd (%p2755_p12), [#allocation10], 4294966784 }
  0xbd   : > { %2166 = dma.done.wait (%p2756_p7), [#allocation13], 256   ;;  %p2757_p8 = pmov %p2750_p0 }
  0xbe   : > { %p465_p11 = scmp.lt.s32.totalorder %s2284_s17, 1  ;;  %vm483_vm0 = vcmask 261120   ;;  %v1901_v14 = vld [vmem:[#allocation8] sm:$0xff]   ;;  %v1902_v15 = vld [vmem:[#allocation6] sm:$0xff]   ;;  %v2199_v16 = vmov 0.0   ;;  %v1903_v17 = vld [vmem:[#allocation8 + $0x8] sm:$0xff]   ;;  %v498_v23 = vlaneseq }
  0xbf   : > { %2168 = vsyncadd (%p2757_p8), [#allocation13], 4294967040  ;;  %1697 = vmatprep.subr.bf16.mxu1 %v2199_v16  ;;  %1689 = vmatprep.subr.bf16.mxu0 %v2199_v16  ;;  %vm2200_vm1 = vmmov 0   ;;  %v1904_v18 = vld [vmem:[#allocation6 + $0x8] sm:$0xff]   ;;  %v2525_v30 = vld [vmem:[#allocation3] sm:$0xff]  ;;  %vm734_vm2 = vcmask 64512  }
  0xc0   : > { %s466_s15 = scalar_select %p465_p11, %s2284_s17, 1  ;;  %1698 = vmatpush3.bf16.msra.mxu1 %v1901_v14  ;;  %1690 = vmatpush3.bf16.msra.mxu0 %v1902_v15  ;;  %v2522_v27 = vshrl.u32 %v498_v23, 7  ;;  %vm796_vm3 = vcmask 1043456   ;;  %vm958_vm4 = vcmask 130112   ;;  %vm1074_vm5 = vcmask 195712  }
  0xc1   : > { %1699 = vmatprep.subr.bf16.mxu1 %v2199_v16  ;;  %1701 = vmatprep.mubr.msk.bf16.mxu1 %vm2200_vm1, %v2199_v16  ;;  %s2201_s13 = smov 120   ;;  %s2202_s16 = smov 112   ;;  %vm1190_vm6 = vcmask 261312   ;;  %vm1375_vm7 = vcmask 523264  }
  0xc2   : > { %s2490_s25 = sshll.u32 %s466_s15, 3  ;;  %1691 = vmatprep.subr.bf16.mxu0 %v2199_v16  ;;  %1693 = vmatprep.mubr.msk.bf16.mxu0 %vm2200_vm1, %v2199_v16  ;;  %v500_v29 = vsub.s32 4, %v2522_v27  ;;  %v505_v31 = vsub.s32 5, %v2522_v27  ;;  %v611_v44 = vsub.s32 1, %v2522_v27  ;;  %v547_v46 = vsub.s32 0, %v2522_v27  ;;  %s2203_s19 = smov 104  }
  0xc3   : > { %s472_s20 = scalar_lea.vmem %s2709_s1, %s2490_s25  ;;  %s468_s12 = scalar_lea.vmem %s2708_s0, %s2490_s25 }
  0xc4   : > { %v481_v0 = vld [vmem:[%s472_s20] sm:$0xff]  ;;  %1700 = vmatpush3.bf16.msra.mxu1 %v1903_v17  ;;  %1692 = vmatpush3.bf16.msra.mxu0 %v1904_v18  ;;  %s476_s30 = scalar_lea.vmem %s2710_s2, %s2490_s25  ;;  %v2529_v32 = vrot.slane %v2525_v30, %v500_v29  ;;  %v2532_v34 = vrot.slane %v2525_v30, %v505_v31  ;;  %v612_v45 = vrot.slane %v2525_v30, %v611_v44  ;;  %s2204_s24 = smov 8  }
  0xc5   : > { %v480_v1 = vld [vmem:[%s468_s12] sm:$0xff]  ;;  %v509_v2 = vsel %vm483_vm0, %v481_v0, 0.0  ;;  %1713 = vmatprep.subr.bf16.mxu1 %v2199_v16  ;;  %1705 = vmatprep.subr.bf16.mxu0 %v2199_v16  ;;  %v548_v50 = vrot.slane %v2525_v30, %v547_v46  ;;  %s2205_s26 = smov 16   ;;  %s2206_s29 = smov 24  }
  0xc6   : > { %v484_v3 = vsel %vm483_vm0, %v480_v1, 0.0  ;;  %510 = vadd.xlane.f32.xlu0 %v509_v2  ;;  %v2518_v19 = vld [vmem:[%s476_s30] sm:$0xff]  ;;  %s462_s27 = sand.u32 1, %s2179_s14   ;;  %s1650_s4 = sshll.u32 %s2284_s17, 7 }
  0xc7   : > { %v525_v20 = vsel %vm483_vm0, %v2518_v19, 0.0  ;;  %s1617_s12 = sshll.u32 %s462_s27, 3  ;;  %p2758_p1 = scmp.ne.s32.totalorder %s2739_s23, 0 }
  0xc8   : > { %s464_s6 = scalar_lea.vmem [#allocation14], %s1617_s12  ;;  %s2207_s17 = smov [#allocation14]  }
  0xc9   : > { %s1458_s30 = sshll.u32 %s464_s6, 4  ;;  %s2667_s30 = int_to_ptr.vmem [resolvable:$true] %s1458_s30 }
  0xca   : > { %485 = vadd.xlane.f32.xlu0 %v484_v3  ;;  %v1905_v3 = vld [vmem:[#allocation9] sm:$0xff]  }
 0x153   : > { %v511_v4 = vpop.xlane.xlu0 %510 }
 0x154   : > { %v512_v5 = vmul.f32 0.03125, %v511_v4  ;;  %v1906_v4 = vld [vmem:[#allocation9 + $0x8] sm:$0xff]  }
 0x156   : > { %v513_v6 = vsub.f32 %v481_v0, %v512_v5 }
 0x157   : > { %v486_v7 = vpop.xlane.xlu0 %485 }
 0x158   : > { %v488_v8 = vmul.f32 0.03125, %v486_v7  ;;  %v514_v9 = vmul.f32 %v513_v6, %v513_v6 }
 0x15a   : > { %v489_v10 = vsub.f32 %v480_v1, %v488_v8  ;;  %v515_v11 = vsel %vm483_vm0, %v514_v9, 0.0 }
 0x15b   : > { %516 = vadd.xlane.f32.xlu1 %v515_v11 }
 0x15c   : > { %v490_v12 = vmul.f32 %v489_v10, %v489_v10 }
 0x15e   : > { %v491_v13 = vsel %vm483_vm0, %v490_v12, 0.0 }
 0x15f   : > { %492 = vadd.xlane.f32.xlu1 %v491_v13 }
 0x163   : > { %526 = vadd.xlane.f32.xlu1 %v525_v20 }
 0x1e8   : > { %v517_v21 = vpop.xlane.xlu1 %516 }
 0x1e9   : > { %v518_v22 = vmul.f32 0.03125, %v517_v21 }
 0x1eb   : > { %v519_v24 = vadd.f32 1e-05, %v518_v22 }
 0x1ec   : > { %v493_v25 = vpop.xlane.xlu1 %492 }
 0x1ed   : > { %1915 = vrsqrt.f32 %v519_v24  ;;  %v494_v26 = vmul.f32 0.03125, %v493_v25 }
 0x1ef   : > { %v495_v28 = vadd.f32 1e-05, %v494_v26 }
 0x1f0   : > { %v527_v62 = vpop.xlane.xlu1 %526 }
 0x1f1   : > { %1917 = vrsqrt.f32 %v495_v28  ;;  %v528_v63 = vmul.f32 0.03125, %v527_v62 }
 0x1f3   : > { %v529_v0 = vsub.f32 %v2518_v19, %v528_v63 }
 0x1f5   : > { %v530_v1 = vmul.f32 %v529_v0, %v529_v0 }
 0x1f7   : > { %v1916_v33 = vpop.eup %1915  ;;  %v531_v2 = vsel %vm483_vm0, %v530_v1, 0.0 }
 0x1f8   : > { %v521_v35 = vmul.f32 %v1916_v33, %v513_v6 }
 0x1fa   : > { %v522_v36 = vmul.f32 %v521_v35, %v2529_v32 }
 0x1fb   : > { %v1918_v37 = vpop.eup %1917 }
 0x1fc   : > { %v523_v38 = vadd.f32 %v522_v36, %v2532_v34  ;;  %v497_v39 = vmul.f32 %v1918_v37, %v489_v10 }
 0x1fe   : > { %v524_v40 = vpack.c.bf16 %v523_v38, %v523_v38  ;;  %v502_v41 = vmul.f32 %v2529_v32, %v497_v39 }
 0x200   : > { %1702 = vmatmul.mubr.msk.bf16.vlgmr.msra.gmra.mrb[0].mxu1 %vm483_vm0, %v524_v40  ;;  %v507_v42 = vadd.f32 %v2532_v34, %v502_v41 }
 0x201   : > { %1715 = vmatprep.mubr.msk.bf16.mxu1 %vm2200_vm1, %v2199_v16 }
 0x202   : > { %v508_v43 = vpack.c.bf16 %v507_v42, %v507_v42 }
 0x204   : > { %1694 = vmatmul.mubr.msk.bf16.vlgmr.msra.gmra.mrb[0].mxu0 %vm483_vm0, %v508_v43 }
 0x205   : > { %1709 = vmatprep.mubr.msk.bf16.mxu0 %vm2200_vm1, %v2199_v16  ;;  %1706 = vmatpush3.bf16.msra.mxu0 %v1905_v3 }
 0x206   : > { %1707 = vmatprep.subr.bf16.mxu0 %v2199_v16 }
 0x209   : > { %1708 = vmatpush3.bf16.msra.mxu0 %v1906_v4 }
 0x20a   : > { %1719 = vmatprep.subr.bf16.mxu0 %v2199_v16 }
 0x2d3   : > { %v662_v47 = vpop.f32.mrb[0].mxu1 }
 0x2d4   : > { %v663_v48 = vadd.f32 %v662_v47, %v612_v45  ;;  %v1703_v49 = vpop.f32.mrb[1].mxu1 }
 0x2d5   : > { %v665_v51 = vpop.f32.mrb[2].mxu1 }
 0x2d6   : > { %v732_v52 = vpack.c.bf16 %v663_v48, %v663_v48  ;;  %v1704_v53 = vpop.f32.mrb[3].mxu1 }
 0x2d7   : > { %v598_v54 = vpop.f32.mrb[0].mxu0 }
 0x2d8   : > { %v599_v55 = vadd.f32 %v598_v54, %v548_v50  ;;  %845 = vrot.lane.b32.xlu0 %v732_v52, %s2201_s13  ;;  %v1695_v56 = vpop.f32.mrb[1].mxu0  ;;  %v739_v57 = vsel %vm734_vm2, %v732_v52, 0 }
 0x2d9   : > { %v601_v58 = vpop.f32.mrb[2].mxu0  ;;  %1714 = vmatpush3.bf16.xpose.msra.mxu1 %v739_v57 }
 0x2da   : > { %v604_v59 = vmul.f32 0.35355338, %v599_v55  ;;  %v1696_v60 = vpop.f32.mrb[3].mxu0  ;;  %1725 = vmatprep.subr.bf16.mxu1 %v2199_v16  ;;  %v674_v55 = vsub.s32 2, %v2522_v27 }
 0x2dc   : > { %v731_v61 = vpack.c.bf16 %v604_v59, %v604_v59  ;;  %v675_v56 = vrot.slane %v2525_v30, %v674_v55 }
 0x2de   : > { %960 = vrot.lane.b32.xlu0 %v731_v61, %s2202_s16  ;;  %842 = vrot.lane.b32.xlu1 %v731_v61, %s2201_s13 }
 0x2e0   : > { %1716 = vmatmul.mubr.msk.bf16.vlgmr.msra.gmra.mrb[4].mxu1 %vm734_vm2, %v731_v61 }
 0x2e1   : > { %1727 = vmatprep.mubr.msk.bf16.mxu1 %vm2200_vm1, %v2199_v16 }
 0x2e2   : > { %1076 = vrot.lane.b32.xlu0 %v731_v61, %s2203_s19  ;;  %962 = vrot.lane.b32.xlu1 %v732_v52, %s2202_s16 }
 0x2e6   : > { %1078 = vrot.lane.b32.xlu1 %v732_v52, %s2203_s19 }
 0x30a   : > { %532 = vadd.xlane.f32.xlu1 %v531_v2 }
 0x34a   : > { %v846_v5 = vpop.permute.xlu0 %845 }
 0x34b   : > { %v851_v6 = vsel %vm734_vm2, %v846_v5, 0 }
 0x34c   : > { %1726 = vmatpush3.bf16.xpose.msra.mxu1 %v851_v6 }
 0x34d   : > { %1737 = vmatprep.subr.bf16.mxu1 %v2199_v16 }
 0x350   : > { %v843_v7 = vpop.permute.xlu1 %842  ;;  %v961_v11 = vpop.permute.xlu0 %960 }
 0x353   : > { %1728 = vmatmul.mubr.msk.bf16.vlgmr.msra.gmra.mrb[8].mxu1 %vm734_vm2, %v843_v7 }
 0x354   : > { %v963_v8 = vpop.permute.xlu1 %962  ;;  %1739 = vmatprep.mubr.msk.bf16.mxu1 %vm2200_vm1, %v2199_v16  ;;  %v1077_v13 = vpop.permute.xlu0 %1076 }
 0x355   : > { %v968_v9 = vsel %vm734_vm2, %v963_v8, 0 }
 0x356   : > { %1738 = vmatpush3.bf16.xpose.msra.mxu1 %v968_v9 }
 0x357   : > { %1749 = vmatprep.subr.bf16.mxu1 %v2199_v16 }
 0x358   : > { %v1079_v10 = vpop.permute.xlu1 %1078 }
 0x359   : > { %v1084_v12 = vsel %vm734_vm2, %v1079_v10, 0 }
 0x35d   : > { %1740 = vmatmul.mubr.msk.bf16.vlgmr.msra.gmra.mrb[12].mxu1 %vm734_vm2, %v961_v11 }
 0x35e   : > { %1750 = vmatpush3.bf16.xpose.msra.mxu1 %v1084_v12  ;;  %1751 = vmatprep.mubr.msk.bf16.mxu1 %vm2200_vm1, %v2199_v16 }
 0x35f   : > { %1761 = vmatprep.subr.bf16.mxu1 %v2199_v16 }
 0x365   : > { %1752 = vmatmul.mubr.msk.bf16.vlgmr.msra.gmra.mrb[16].mxu1 %vm734_vm2, %v1077_v13 }
 0x366   : > { %1765 = vmatprep.mubr.msk.bf16.mxu1 %vm2200_vm1, %v2199_v16 }
 0x397   : > { %v533_v14 = vpop.xlane.xlu1 %532 }
 0x398   : > { %v534_v15 = vmul.f32 0.03125, %v533_v14 }
 0x39a   : > { %v535_v17 = vadd.f32 1e-05, %v534_v15 }
 0x39c   : > { %1919 = vrsqrt.f32 %v535_v17 }
 0x3a6   : > { %v1920_v18 = vpop.eup %1919 }
 0x3a7   : > { %v537_v20 = vmul.f32 %v1920_v18, %v529_v0 }
 0x3a9   : > { %v538_v21 = vmul.f32 %v537_v20, %v2529_v32 }
 0x3ab   : > { %v539_v22 = vadd.f32 %v538_v21, %v2532_v34 }
 0x3ad   : > { %v540_v23 = vpack.c.bf16 %v539_v22, %v539_v22 }
 0x3af   : > { %1710 = vmatmul.mubr.msk.bf16.vlgmr.msra.gmra.mrb[4].mxu0 %vm483_vm0, %v540_v23 }
 0x3b0   : > { %1721 = vmatprep.mubr.msk.bf16.mxu0 %vm2200_vm1, %v2199_v16 }
 0x3b3   : > { %v775_v24 = vpop.f32.mrb[4].mxu1 }
 0x3b4   : > { %v1717_v25 = vpop.f32.mrb[5].mxu1  ;;  %v781_v26 = vsel %vm734_vm2, %v775_v24, -inf }
 0x3b5   : > { %782 = vmax.xlane.f32.xlu0 %v781_v26  ;;  %v778_v28 = vpop.f32.mrb[6].mxu1 }
 0x3b6   : > { %v1718_v29 = vpop.f32.mrb[7].mxu1 }
 0x426   : > { %v887_v31 = vpop.f32.mrb[8].mxu1 }
 0x427   : > { %v1729_v33 = vpop.f32.mrb[9].mxu1  ;;  %v893_v35 = vsel %vm734_vm2, %v887_v31, -inf }
 0x428   : > { %894 = vmax.xlane.f32.xlu0 %v893_v35  ;;  %v890_v36 = vpop.f32.mrb[10].mxu1 }
 0x429   : > { %v1730_v37 = vpop.f32.mrb[11].mxu1 }
 0x430   : > { %v1004_v38 = vpop.f32.mrb[12].mxu1 }
 0x431   : > { %v1741_v39 = vpop.f32.mrb[13].mxu1  ;;  %v1010_v40 = vsel %vm734_vm2, %v1004_v38, -inf }
 0x432   : > { %1011 = vmax.xlane.f32.xlu0 %v1010_v40  ;;  %v1007_v41 = vpop.f32.mrb[14].mxu1 }
 0x433   : > { %v1742_v42 = vpop.f32.mrb[15].mxu1 }
 0x438   : > { %v1120_v43 = vpop.f32.mrb[16].mxu1 }
 0x439   : > { %v1753_v45 = vpop.f32.mrb[17].mxu1  ;;  %v1126_v47 = vsel %vm734_vm2, %v1120_v43, -inf }
 0x43a   : > { %1127 = vmax.xlane.f32.xlu1 %v1126_v47  ;;  %v1123_v48 = vpop.f32.mrb[18].mxu1 }
 0x43b   : > { %v1754_v49 = vpop.f32.mrb[19].mxu1 }
 0x442   : > { %v783_v50 = vpop.xlane.xlu0 %782 }
 0x443   : > { %v784_v51 = vsub.f32 %v775_v24, %v783_v50 }
 0x445   : > { %v785_v52 = vmul.f32 1.442695, %v784_v51 }
 0x447   : > { %1921 = vpow2.f32 %v785_v52 }
 0x451   : > { %v1922_v53 = vpop.eup %1921 }
 0x452   : > { %v787_v54 = vsel %vm734_vm2, %v1922_v53, 0.0 }
 0x453   : > { %788 = vadd.xlane.f32.xlu0 %v787_v54 }
 0x482   : > { %v725_v57 = vpop.f32.mrb[4].mxu0 }
 0x483   : > { %v726_v58 = vadd.f32 %v725_v57, %v675_v56  ;;  %v1711_v59 = vpop.f32.mrb[5].mxu0  ;;  %v1907_v57 = vld [vmem:[#allocation11] sm:$0xff]  }
 0x484   : > { %v728_v60 = vpop.f32.mrb[6].mxu0  ;;  %1762 = vmatpush3.bf16.msra.mxu1 %v1907_v57 }
 0x485   : > { %v733_v61 = vpack.c.bf16 %v726_v58, %v726_v58  ;;  %v1712_v62 = vpop.f32.mrb[7].mxu0  ;;  %v1908_v58 = vld [vmem:[#allocation11 + $0x8] sm:$0xff]   ;;  %1763 = vmatprep.subr.bf16.mxu1 %v2199_v16 }
 0x487   : > { %v798_v63 = vsel %vm796_vm3, %v733_v61, 0 }
 0x488   : > { %1720 = vmatpush3.bf16.msra.mxu0 %v798_v63  ;;  %1764 = vmatpush3.bf16.msra.mxu1 %v1908_v58 }
 0x489   : > { %1731 = vmatprep.subr.bf16.mxu0 %v2199_v16  ;;  %1777 = vmatprep.subr.bf16.mxu1 %v2199_v16 }
 0x4b5   : > { %v895_v0 = vpop.xlane.xlu0 %894 }
 0x4b6   : > { %v896_v1 = vsub.f32 %v887_v31, %v895_v0 }
 0x4b8   : > { %v897_v2 = vmul.f32 1.442695, %v896_v1 }
 0x4ba   : > { %1923 = vpow2.f32 %v897_v2 }
 0x4bf   : > { %v1012_v3 = vpop.xlane.xlu0 %1011 }
 0x4c0   : > { %v1013_v4 = vsub.f32 %v1004_v38, %v1012_v3 }
 0x4c2   : > { %v1014_v5 = vmul.f32 1.442695, %v1013_v4  ;;  %v1200_v4 = vsub.s32 3, %v2522_v27 }
 0x4c4   : > { %v1924_v6 = vpop.eup %1923  ;;  %1925 = vpow2.f32 %v1014_v5  ;;  %v1201_v5 = vrot.slane %v2525_v30, %v1200_v4 }
 0x4c5   : > { %v899_v7 = vsel %vm734_vm2, %v1924_v6, 0.0 }
 0x4c6   : > { %900 = vadd.xlane.f32.xlu1 %v899_v7 }
 0x4c7   : > { %v1128_v11 = vpop.xlane.xlu1 %1127 }
 0x4c8   : > { %v1129_v12 = vsub.f32 %v1120_v43, %v1128_v11 }
 0x4ca   : > { %v1130_v13 = vmul.f32 1.442695, %v1129_v12 }
 0x4ce   : > { %v1926_v8 = vpop.eup %1925 }
 0x4cf   : > { %v1016_v9 = vsel %vm734_vm2, %v1926_v8, 0.0 }
 0x4d0   : > { %1017 = vadd.xlane.f32.xlu0 %v1016_v9 }
 0x4d7   : > { %1022 = vrot.lane.b32.xlu1 %v733_v61, %s2202_s16 }
 0x4e0   : > { %v789_v10 = vpop.xlane.xlu0 %788 }
 0x4e1   : > { %1927 = vrcp.f32 %v789_v10 }
 0x4e2   : > { %1929 = vpow2.f32 %v1130_v13 }
 0x4e6   : > { %906 = vrot.lane.b32.xlu0 %v733_v61, %s2201_s13 }
 0x4eb   : > { %v1928_v14 = vpop.eup %1927 }
 0x4ec   : > { %v791_v15 = vmul.f32 %v1928_v14, %v1922_v53  ;;  %v1930_v18 = vpop.eup %1929 }
 0x4ed   : > { %v1132_v20 = vsel %vm734_vm2, %v1930_v18, 0.0 }
 0x4ee   : > { %v792_v17 = vpack.c.bf16 %v791_v15, %v791_v15 }
 0x4f0   : > { %1722 = vmatmul.mubr.msk.bf16.vlgmr.msra.gmra.mrb[8].mxu0 %vm734_vm2, %v792_v17 }
 0x4f1   : > { %1733 = vmatprep.mubr.msk.bf16.mxu0 %vm2200_vm1, %v2199_v16 }
 0x4fb   : > { %1133 = vadd.xlane.f32.xlu1 %v1132_v20  ;;  %v1909_v20 = vld [vmem:[#allocation12] sm:$0xff]  }
 0x50c   : > { %1138 = vrot.lane.b32.xlu1 %v733_v61, %s2203_s19  ;;  %s2665_s19 = scalar_lea.hbm %s2718_s10, %s1650_s4 }
 0x553   : > { %v901_v21 = vpop.xlane.xlu1 %900 }
 0x554   : > { %1931 = vrcp.f32 %v901_v21  ;;  %v1910_v21 = vld [vmem:[#allocation12 + $0x8] sm:$0xff]  }
 0x557   : > { %v1023_v28 = vpop.permute.xlu1 %1022 }
 0x558   : > { %v1028_v31 = vsel %vm796_vm3, %v1023_v28, 0 }
 0x55d   : > { %v1018_v22 = vpop.xlane.xlu0 %1017 }
 0x55e   : > { %v1932_v23 = vpop.eup %1931  ;;  %1933 = vrcp.f32 %v1018_v22  ;;  %v1912_v22 = vld [vmem:[%s2717_s9 + $0x8] sm:$0xff]  }
 0x55f   : > { %v903_v24 = vmul.f32 %v1932_v23, %v1924_v6 }
 0x561   : > { %v907_v25 = vpop.permute.xlu0 %906  ;;  %v904_v29 = vpack.c.bf16 %v903_v24, %v903_v24 }
 0x562   : > { %v912_v26 = vsel %vm796_vm3, %v907_v25, 0 }
 0x563   : > { %1732 = vmatpush3.bf16.msra.mxu0 %v912_v26 }
 0x564   : > { %1743 = vmatprep.subr.bf16.mxu0 %v2199_v16 }
 0x566   : > { %1734 = vmatmul.mubr.msk.bf16.vlgmr.msra.gmra.mrb[12].mxu0 %vm734_vm2, %v904_v29 }
 0x567   : > { %1744 = vmatpush3.bf16.msra.mxu0 %v1028_v31  ;;  %1745 = vmatprep.mubr.msk.bf16.mxu0 %vm2200_vm1, %v2199_v16 }
 0x568   : > { %v1934_v33 = vpop.eup %1933  ;;  %1755 = vmatprep.subr.bf16.mxu0 %v2199_v16 }
 0x569   : > { %v1020_v35 = vmul.f32 %v1934_v33, %v1926_v8 }
 0x56b   : > { %v1021_v36 = vpack.c.bf16 %v1020_v35, %v1020_v35  ;;  %v1913_v35 = vld [vmem:[%s2717_s9 + $0x10] sm:$0xff]  }
 0x56e   : > { %1746 = vmatmul.mubr.msk.bf16.vlgmr.msra.gmra.mrb[16].mxu0 %vm734_vm2, %v1021_v36  ;;  %v1914_v36 = vld [vmem:[%s2717_s9 + $0x18] sm:$0xff]  }
 0x56f   : > { %1757 = vmatprep.mubr.msk.bf16.mxu0 %vm2200_vm1, %v2199_v16 }
 0x588   : > { %v1134_v37 = vpop.xlane.xlu1 %1133 }
 0x589   : > { %1935 = vrcp.f32 %v1134_v37  ;;  %v479_v37 = vld [vmem:[#allocation3 + $0x8] sm:$0x3] }
 0x58c   : > { %v1139_v38 = vpop.permute.xlu1 %1138 }
 0x58d   : > { %v1144_v39 = vsel %vm796_vm3, %v1139_v38, 0 }
 0x58e   : > { %1756 = vmatpush3.bf16.msra.mxu0 %v1144_v39 }
 0x58f   : > { %1769 = vmatprep.subr.bf16.mxu0 %v2199_v16 }
 0x593   : > { %v1936_v40 = vpop.eup %1935 }
 0x594   : > { %v1136_v41 = vmul.f32 %v1936_v40, %v1930_v18 }
 0x596   : > { %v1137_v42 = vpack.c.bf16 %v1136_v41, %v1136_v41 }
 0x598   : > { %1758 = vmatmul.mubr.msk.bf16.vlgmr.msra.gmra.mrb[20].mxu0 %vm734_vm2, %v1137_v42 }
 0x599   : > { %1773 = vmatprep.mubr.msk.bf16.mxu0 %vm2200_vm1, %v2199_v16  ;;  %1770 = vmatpush3.bf16.msra.mxu0 %v1909_v20 }
 0x59a   : > { %1771 = vmatprep.subr.bf16.mxu0 %v2199_v16 }
 0x59d   : > { %1772 = vmatpush3.bf16.msra.mxu0 %v1910_v21 }
 0x5c3   : > { %v834_v43 = vpop.f32.mrb[8].mxu0 }
 0x5c4   : > { %840 = vst.msk [vmem:[#allocation2] sm:$0xff] %vm734_vm2, %v834_v43  ;;  %v1723_v45 = vpop.f32.mrb[9].mxu0 }
 0x5c5   : > { %v837_v47 = vpop.f32.mrb[10].mxu0 }
 0x5c6   : > { %v1724_v48 = vpop.f32.mrb[11].mxu0 }
 0x639   : > { %v948_v49 = vpop.f32.mrb[12].mxu0 }
 0x63a   : > { %955 = vrot.lane.b32.xlu1 %v948_v49, %s2204_s24  ;;  %v1735_v50 = vpop.f32.mrb[13].mxu0  ;;  %s1445_s24 = scalar_lea.sflag [#allocation5], %s462_s27 }
 0x63b   : > { %v951_v51 = vpop.f32.mrb[14].mxu0 }
 0x63c   : > { %v1736_v52 = vpop.f32.mrb[15].mxu0 }
 0x641   : > { %v1064_v53 = vpop.f32.mrb[16].mxu0 }
 0x642   : > { %1071 = vrot.lane.b32.xlu0 %v1064_v53, %s2205_s26  ;;  %v1747_v54 = vpop.f32.mrb[17].mxu0  ;;  %s2109_s26 = scalar_lea.vmem %s2667_s30, 128 }
 0x643   : > { %v1067_v55 = vpop.f32.mrb[18].mxu0  ;;  %p2110_p13 = scmp.ne.s32.totalorder %s2667_s30, %s2109_s26 }
 0x644   : > { %v1748_v56 = vpop.f32.mrb[19].mxu0 }
 0x645   : > { %p2111_p6 = pnand %p2110_p13, %p2758_p1 }
 0x647   : > { %p2112_p9 = pneg %p2111_p6 }
 0x66b   : > { %v1180_v59 = vpop.f32.mrb[20].mxu0 }
 0x66c   : > { %1187 = vrot.lane.b32.xlu1 %v1180_v59, %s2206_s29  ;;  %v1759_v60 = vpop.f32.mrb[21].mxu0  ;;  %v1435_v59 = vsub.s32 6, %v2522_v27  ;;  %s2113_s29 = sshll.u32 %s2207_s17, 4  ;;  %s2114_s29 = int_to_ptr.vmem [resolvable:$false] %s2113_s29 }
 0x66d   : > { %v1183_v61 = vpop.f32.mrb[22].mxu0  ;;  %v1440_v60 = vsub.s32 7, %v2522_v27  ;;  %s2115_s11 = scalar_lea.vmem %s2114_s29, 256  ;;  %p2116_p5 = scmp.lt.s32.totalorder %s2667_s30, %s2114_s29 }
 0x66e   : > { %v1760_v62 = vpop.f32.mrb[23].mxu0  ;;  %v1436_v61 = vrot.slane %v2525_v30, %v1435_v59  ;;  %p2117_p0 = scmp.lt.s32.totalorder %s2115_s11, %s2109_s26 }
 0x670   : > { %p2118_p10 = por %p2117_p0, %p2116_p5 }
 0x672   : > { %p2119_p2 = pnand %p2118_p10, %p2112_p9 }
 0x6ac   : > { %v956_v63 = vpop.permute.xlu1 %955 }
 0x6ad   : > { %959 = vst.msk [vmem:[#allocation2] sm:$0xff] %vm958_vm4, %v956_v63 }
 0x6b4   : > { %v1072_v0 = vpop.permute.xlu0 %1071 }
 0x6b5   : > { %1075 = vst.msk [vmem:[#allocation2] sm:$0xff] %vm1074_vm5, %v1072_v0  ;;  %v1441_v0 = vrot.slane %v2525_v30, %v1440_v60 }
 0x6de   : > { %v1188_v1 = vpop.permute.xlu1 %1187 }
 0x6df   : > { %1191 = vst.msk [vmem:[#allocation2] sm:$0xff] %vm1190_vm6, %v1188_v1 }
 0x6e6   : > { %v1192_v2 = vld [vmem:[#allocation2] sm:$0xff] }
 0x6e7   : > { %v1193_v3 = vpack.c.bf16 %v1192_v2, %v1192_v2 }
 0x6e9   : > { %1766 = vmatmul.mubr.msk.bf16.vlgmr.msra.gmra.mrb[20].mxu1 %vm483_vm0, %v1193_v3 }
 0x6ea   : > { %1785 = vmatprep.mubr.msk.bf16.mxu1 %vm2200_vm1, %v2199_v16 }
 0x7bc   : > { %v1251_v6 = vpop.f32.mrb[20].mxu1 }
 0x7bd   : > { %v1252_v7 = vadd.f32 %v1251_v6, %v1201_v5  ;;  %v1767_v8 = vpop.f32.mrb[21].mxu1 }
 0x7be   : > { %v1254_v9 = vpop.f32.mrb[22].mxu1 }
 0x7bf   : > { %v1768_v10 = vpop.f32.mrb[23].mxu1  ;;  %v1257_v11 = vadd.f32 %v1252_v7, %v2518_v19  ;;  %v1911_v19 = vld [vmem:[%s2717_s9] sm:$0xff]  }
 0x7c0   : > { %1778 = vmatpush3.bf16.msra.mxu1 %v1911_v19 }
 0x7c1   : > { %v1258_v12 = vsel %vm483_vm0, %v1257_v11, 0.0  ;;  %1779 = vmatprep.subr.bf16.mxu1 %v2199_v16 }
 0x7c2   : > { %1259 = vadd.xlane.f32.xlu0 %v1258_v12 }
 0x7c4   : > { %1780 = vmatpush3.bf16.msra.mxu1 %v1912_v22 }
 0x7c5   : > { %1781 = vmatprep.subr.bf16.mxu1 %v2199_v16 }
 0x7c8   : > { %1782 = vmatpush3.bf16.msra.mxu1 %v1913_v35 }
 0x7c9   : > { %1783 = vmatprep.subr.bf16.mxu1 %v2199_v16  ;;  %v1350_v16 = vrot.slane %v479_v37, %v547_v46 }
 0x7cc   : > { %1784 = vmatpush3.bf16.msra.mxu1 %v1914_v36 }
 0x84f   : > { %v1260_v13 = vpop.xlane.xlu0 %1259 }
 0x850   : > { %v1261_v14 = vmul.f32 0.03125, %v1260_v13 }
 0x852   : > { %v1262_v15 = vsub.f32 %v1257_v11, %v1261_v14 }
 0x854   : > { %v1263_v17 = vmul.f32 %v1262_v15, %v1262_v15 }
 0x856   : > { %v1264_v18 = vsel %vm483_vm0, %v1263_v17, 0.0 }
 0x857   : > { %1265 = vadd.xlane.f32.xlu1 %v1264_v18 }
 0x8e4   : > { %v1266_v23 = vpop.xlane.xlu1 %1265 }
 0x8e5   : > { %v1267_v24 = vmul.f32 0.03125, %v1266_v23 }
 0x8e7   : > { %v1268_v25 = vadd.f32 1e-05, %v1267_v24 }
 0x8e9   : > { %1937 = vrsqrt.f32 %v1268_v25 }
 0x8f3   : > { %v1938_v26 = vpop.eup %1937 }
 0x8f4   : > { %v1270_v28 = vmul.f32 %v1938_v26, %v1262_v15 }
 0x8f6   : > { %v1271_v29 = vmul.f32 %v1270_v28, %v2529_v32  ;;  %v1281_v32 = vrot.slane %v479_v37, %v611_v44 }
 0x8f8   : > { %v1272_v31 = vadd.f32 %v1271_v29, %v2532_v34 }
 0x8fa   : > { %v1273_v33 = vpack.c.bf16 %v1272_v31, %v1272_v31 }
 0x8fc   : > { %1774 = vmatmul.mubr.msk.bf16.vlgmr.msra.gmra.mrb[24].mxu0 %vm483_vm0, %v1273_v33 }
 0x9cf   : > { %v1331_v34 = vpop.f32.mrb[24].mxu0 }
 0x9d0   : > { %v1332_v38 = vadd.f32 %v1331_v34, %v1281_v32  ;;  %v1775_v39 = vpop.f32.mrb[25].mxu0 }
 0x9d1   : > { %v1334_v40 = vpop.f32.mrb[26].mxu0 }
 0x9d2   : > { %v1337_v41 = vmax.f32 %v1332_v38, 0.0  ;;  %v1776_v42 = vpop.f32.mrb[27].mxu0 }
 0x9d4   : > { %v1338_v43 = vpack.c.bf16 %v1337_v41, %v1337_v41 }
 0x9d6   : > { %1786 = vmatmul.mubr.msk.bf16.vlgmr.msra.gmra.mrb[24].mxu1 %vm1375_vm7, %v1338_v43 }
 0xaa9   : > { %v1413_v45 = vpop.f32.mrb[24].mxu1 }
 0xaaa   : > { %v1414_v47 = vadd.f32 %v1413_v45, %v1350_v16  ;;  %v1787_v48 = vpop.f32.mrb[25].mxu1 }
 0xaab   : > { %v1416_v49 = vpop.f32.mrb[26].mxu1 }
 0xaac   : > { %v1788_v50 = vpop.f32.mrb[27].mxu1  ;;  %v1419_v51 = vadd.f32 %v1414_v47, %v1272_v31 }
 0xaae   : > { %v1420_v44 = vsel %vm483_vm0, %v1419_v51, 0.0 }
 0xaaf   : > { %1421 = vadd.xlane.f32.xlu0 %v1420_v44 }
 0xb3c   : > { %v1422_v52 = vpop.xlane.xlu0 %1421 }
 0xb3d   : > { %v1423_v53 = vmul.f32 0.03125, %v1422_v52 }
 0xb3f   : > { %v1424_v54 = vsub.f32 %v1419_v51, %v1423_v53 }
 0xb41   : > { %v1425_v55 = vmul.f32 %v1424_v54, %v1424_v54 }
 0xb43   : > { %v1426_v56 = vsel %vm483_vm0, %v1425_v55, 0.0 }
 0xb44   : > { %1427 = vadd.xlane.f32.xlu0 %v1426_v56 }
 0xbd1   : > { %v1428_v57 = vpop.xlane.xlu0 %1427 }
 0xbd2   : > { %v1429_v46 = vmul.f32 0.03125, %v1428_v57 }
 0xbd4   : > { %v1430_v58 = vadd.f32 1e-05, %v1429_v46 }
 0xbd6   : > { %1939 = vrsqrt.f32 %v1430_v58 }
 0xbe0   : > { %v1940_v62 = vpop.eup %1939 }
 0xbe1   : > { %v1432_v63 = vmul.f32 %v1940_v62, %v1424_v54 }
 0xbe3   : > { %v1437_v1 = vmul.f32 %v1436_v61, %v1432_v63 }
 0xbe5   : > { %v1442_v2 = vadd.f32 %v1441_v0, %v1437_v1 }
 0xbe7   : > { %1443 = vst.msk [vmem:[%s464_s6] sm:$0xff] %vm483_vm0, %v1442_v2 }
 0xbe8   : > { %2122 = shalt.err (!%p2119_p2)
}
 0xbe9   : > { %s2123_s22 = scalar_lea.hbm %s2665_s19, 128  ;;  %s2127_s28 = scalar_lea.hbm %s2718_s10, 256 }
 0xbea   : > { %p2124_p3 = scmp.ne.s32.totalorder %s2665_s19, %s2123_s22  ;;  %p2128_p7 = scmp.lt.u32.totalorder %s2665_s19, %s2718_s10 }
 0xbeb   : > { %p2129_p8 = scmp.lt.u32.totalorder %s2127_s28, %s2123_s22  ;;  %p2131_p13 = scmp.lt.u32.totalorder %s2123_s22, %s2665_s19 }
 0xbec   : > { %p2125_p4 = pnand %p2124_p3, %p2758_p1 }
 0xbed   : > { %p2130_p11 = por %p2129_p8, %p2128_p7 }
 0xbee   : > { %p2126_p12 = pneg %p2125_p4 }
 0xbef   : > { %p2132_p6 = por %p2131_p13, %p2130_p11 }
 0xbf1   : > { %p2133_p9 = pnand %p2132_p6, %p2126_p12 }
 0xbf3   : > { %2136 = shalt.err (!%p2133_p9)
}
 0xbf4   : > { %1813 = dma.vmem_to_hbm [thread:$0]  (%p2758_p1), %s2667_s30, 128, %s2665_s19, %s1445_s24  }
 0xbf5 PF: > { %s2759_s21 = sld [smem:[#allocation22_spill]]  ;;  %s2760_s27 = sld [smem:[#allocation20_spill]] }
 0xbf6   : > { %s2761_s12 = sld [smem:[#allocation25_spill]] }
 0xbfb   : > { %p1850_p5 = scmp.ge.s32.totalorder %s2759_s21, 2  ;;  %s1470_s4 = sand.u32 1, %s2760_s27  }
 0xbfc   : > { %p2762_p0 = scmp.ne.s32.totalorder %s2761_s12, 0  ;;  %s1471_s6 = scalar_lea.sflag [#allocation5], %s1470_s4 }
 0xbfe   : > { %p1835_p10 = pnand %p1850_p5, %p2762_p0 }
 0xc00   : > { %2170 = dma.done.wait (!%p1835_p10), %s1471_s6, 128  }
 0xc01   : > { %2172 = vsyncadd (!%p1835_p10), %s1471_s6, 4294967168  ;;  %s2763_s16 = sld [smem:[#allocation23_spill]]  ;;  %s2764_s26 = sld [smem:[#allocation21_spill]] }
 0xc02   : > { %s2765_s15 = sld [smem:[#allocation24_spill]]  ;;  %s2766_s13 = smov %s2179_s14 }
 0xc07   : > { %p24_p2 = scmp.ge.s32.totalorder %s2763_s16, 4   ;;  %s2767_s14 = smov %s2764_s26 }
 0xc09   :  { %26 = sbr.rel (!%p24_p2) target bundleno = 10 (0xa), region = 126 }
 0xc10   :  { %1476 = vsyncpa [#allocation4], 1 }
 0xc11   :  { %1478 = vsyncpa [#allocation4 + $0x1], 1 }
 0xc12   :  { %1479 = vsyncpa [#allocation7], 1 }
 0xc13   :  { %1480 = vsyncpa [#allocation10], 1 }
 0xc14   :  { %1481 = vsyncpa [#allocation13], 1 }
 0xc15   :  { %1482 = vsyncpa [#allocation5], 1 }
 0xc16   :  { %1484 = vsyncpa [#allocation5 + $0x1], 1 }

</bundles_post_ra>
